<compile_context>
chip_gen: v7x
topology: tpu7x:2x2x1
jax: 0.10.0
libtpu: 0.0.40
codegen_flags: <defaults>
</compile_context>

<pallas_src>
import math
import functools

import jax
import jax.numpy as jnp
from jax import lax
from jax.experimental import pallas as pl
from jax.experimental.pallas import tpu as pltpu


def sab_kernel(x_ref, wqkv_ref, bqkv_ref, wo_ref, bo_ref, o_ref, acc_ref, *,
               num_heads, dim_v, n_tokens, block_b):
    D = dim_v
    dh = D // num_heads
    N = n_tokens
    scale = 1.0 / math.sqrt(D)  # note: sqrt(dim_V), not head dim (matches reference)

    x = x_ref[...]                                                   # (block_b*N, D_in)

    # Fused QKV projection: one MXU matmul over the whole slab, f32 accumulation.
    qkv = jnp.dot(x, wqkv_ref[...],
                  preferred_element_type=jnp.float32) + bqkv_ref[...]  # (rows, 3*D) f32

    q = qkv[:, :D]                 # unscaled: needed for the O_h = Q_h + ... residual
    k = qkv[:, D:2 * D] * scale    # fold softmax scale into K once (rows*D elems)
    v = qkv[:, 2 * D:]

    # Per-(batch, head) attention; results written straight into the f32 accumulator
    # (no concatenate of narrow head slices).
    for b in range(block_b):                       # static unroll over batches in block
        r0 = b * N
        for h in range(num_heads):                 # static unroll over heads
            c0 = h * dh
            qh = q[r0:r0 + N, c0:c0 + dh]          # (N, dh)
            kh = k[r0:r0 + N, c0:c0 + dh]
            vh = v[r0:r0 + N, c0:c0 + dh]

            # Q_h @ K_h^T without materializing a transpose: contract the head dim.
            s = lax.dot_general(qh, kh,
                                dimension_numbers=(((1,), (1,)), ((), ())),
                                preferred_element_type=jnp.float32)   # (N, N)
            s = s - jnp.max(s, axis=-1, keepdims=True)
            e = jnp.exp(s)
            av = jnp.dot(e, vh, preferred_element_type=jnp.float32)   # (N, dh)
            inv = pl.reciprocal(jnp.sum(e, axis=-1, keepdims=True), approx=True)
            acc_ref[r0:r0 + N, c0:c0 + dh] = qh + av * inv            # O_h = Q_h + A_h V_h

    # Output MLP + residual on the full slab (single MXU matmul), f32 epilogue.
    o = acc_ref[...]                                                  # (rows, D) f32
    proj = jnp.dot(o, wo_ref[...].astype(jnp.float32),
                   preferred_element_type=jnp.float32) + bo_ref[...].astype(jnp.float32)
    out = o + jnp.maximum(proj, 0.0)
    o_ref[...] = out.astype(o_ref.dtype)


def _choose_block_batches(B, N):
    """Pick how many batches to process per grid step.

    Prefer the smallest divisor of B whose row count (bt*N) reaches >=128 sublanes;
    rows must be a multiple of 8 (or the block must cover the whole array).
    """
    valid = [bt for bt in range(1, B + 1)
             if B % bt == 0 and ((bt * N) % 8 == 0 or bt == B)]
    for bt in valid:
        if bt * N >= 128:
            return bt
    capped = [bt for bt in valid if bt * N <= 512]
    return capped[-1] if capped else valid[0]


def sab_forward(x, wq, bq, wk, bk, wv, bv, wo, bo, *, num_heads):
    B, N, D_in = x.shape
    D_out = wq.shape[1]
    assert D_out % num_heads == 0, "dim_V must be divisible by num_heads"

    block_b = _choose_block_batches(B, N)
    rows = block_b * N
    grid = (B // block_b,)

    # Fuse the three projection weights/biases -> one QKV matmul inside the kernel.
    w_qkv = jnp.concatenate([wq, wk, wv], axis=1)                 # (D_in, 3*D_out)
    b_qkv = jnp.concatenate([bq.reshape(1, -1), bk.reshape(1, -1),
                             bv.reshape(1, -1)], axis=1)          # (1, 3*D_out)
    bo2 = bo.reshape(1, -1)

    # Flatten batch+set dims -> lane-major 2-D slabs (single contiguous store/step).
    x2 = x.reshape(B * N, D_in)

    kernel = functools.partial(sab_kernel, num_heads=num_heads, dim_v=D_out,
                               n_tokens=N, block_b=block_b)

    # Rough VMEM budget (double-buffered blocks + resident weights + f32 scratch),
    # kept well under v7x's 64 MiB physical VMEM.
    itemsize = jnp.dtype(x.dtype).itemsize
    est = (2 * rows * D_in * itemsize
           + 2 * rows * D_out * itemsize
           + rows * D_out * 4
           + 4 * rows * 3 * D_out * 4
           + 2 * (D_in * 3 * D_out + 3 * D_out + D_out * D_out + D_out) * itemsize)
    vmem_limit = int(min(32 * 1024 * 1024, max(4 * 1024 * 1024, 8 * est)))

    out2 = pl.pallas_call(
        kernel,
        out_shape=jax.ShapeDtypeStruct((B * N, D_out), x.dtype),
        grid=grid,
        in_specs=[
            pl.BlockSpec((rows, D_in), lambda i: (i, 0)),          # x slab
            pl.BlockSpec((D_in, 3 * D_out), lambda i: (0, 0)),     # fused Wqkv
            pl.BlockSpec((1, 3 * D_out), lambda i: (0, 0)),        # fused bqkv
            pl.BlockSpec((D_out, D_out), lambda i: (0, 0)),        # Wo
            pl.BlockSpec((1, D_out), lambda i: (0, 0)),            # bo
        ],
        out_specs=pl.BlockSpec((rows, D_out), lambda i: (i, 0)),
        scratch_shapes=[pltpu.VMEM((rows, D_out), jnp.float32)],
        compiler_params=pltpu.CompilerParams(
            dimension_semantics=("parallel",),
            vmem_limit_bytes=vmem_limit,
        ),
    )(x2, w_qkv, b_qkv, wo, bo2)

    return out2.reshape(B, N, D_out)


def sab_reference(x, wq, bq, wk, bk, wv, bv, wo, bo, *, num_heads):
    """Pure-JAX mirror of the PyTorch MAB(X, X) forward (ln=False) for verification."""
    B, N, _ = x.shape
    D_out = wq.shape[1]
    dh = D_out // num_heads
    q = x @ wq + bq
    k = x @ wk + bk
    v = x @ wv + bv

    # torch.cat(Q.split(dh, 2), 0) -> (H*B, N, dh)
    def split_cat(t):
        return jnp.concatenate([t[:, :, h * dh:(h + 1) * dh] for h in range(num_heads)], axis=0)

    q_, k_, v_ = split_cat(q), split_cat(k), split_cat(v)
    a = jax.nn.softmax(jnp.einsum('bqd,bkd->bqk', q_, k_) / math.sqrt(D_out), axis=-1)
    o_ = q_ + jnp.einsum('bqk,bkd->bqd', a, v_)
    # torch.cat(O.split(B, 0), 2) -> (B, N, D_out)
    o = jnp.concatenate([o_[h * B:(h + 1) * B] for h in range(num_heads)], axis=-1)
    return o + jax.nn.relu(o @ wo + bo)


if __name__ == "__main__":
    B, N, D_in, D_out, H = 2, 8, 16, 32, 8

    key = jax.random.PRNGKey(0)
    keys = jax.random.split(key, 5)

    x = jax.random.normal(keys[0], (B, N, D_in), jnp.float32)

    def linear_init(k, fan_in, fan_out):
        # deterministic uniform(-1/sqrt(fan_in), 1/sqrt(fan_in)) like nn.Linear
        kw, kb = jax.random.split(k)
        bound = 1.0 / math.sqrt(fan_in)
        w = jax.random.uniform(kw, (fan_in, fan_out), jnp.float32, -bound, bound)
        b = jax.random.uniform(kb, (1, fan_out), jnp.float32, -bound, bound)
        return w, b

    wq, bq = linear_init(keys[1], D_in, D_out)
    wk, bk = linear_init(keys[2], D_in, D_out)
    wv, bv = linear_init(keys[3], D_in, D_out)
    wo, bo = linear_init(keys[4], D_out, D_out)

    out = sab_forward(x, wq, bq, wk, bk, wv, bv, wo, bo, num_heads=H)
    out = jax.block_until_ready(out)

    ref = sab_reference(x, wq, bq, wk, bk, wv, bv, wo, bo, num_heads=H)
    assert out.shape == (B, N, D_out)
    # Tolerance accommodates the EUP approximate reciprocal used for softmax
    # normalization; real bugs show up as O(0.1-1) errors.
    assert jnp.allclose(out, ref, atol=5e-3, rtol=5e-3), "Pallas output mismatch vs reference"

    print("KERNEL_OK")
</pallas_src>

<mosaic_0001>
module attributes {stable_mosaic.version = 11 : i64} {
  func.func @sab_kernel(%arg0: i32, %arg1: memref<16x16xf32, #tpu.memory_space<vmem>>, %arg2: memref<16x96xf32, #tpu.memory_space<vmem>>, %arg3: memref<1x96xf32, #tpu.memory_space<vmem>>, %arg4: memref<32x32xf32, #tpu.memory_space<vmem>>, %arg5: memref<1x32xf32, #tpu.memory_space<vmem>>, %arg6: memref<16x32xf32, #tpu.memory_space<vmem>>, %arg7: memref<16x32xf32, #tpu.memory_space<vmem>>) attributes {dimension_semantics = [#tpu.dimension_semantics<parallel>], iteration_bounds = array<i64: 1>, scalar_prefetch = 0 : i64, scratch_operands = 1 : i64, tpu.core_type = #tpu.core_type<tc>, window_params = [{transform_indices = @transform_0, window_bounds = array<i64: 16, 16>}, {pipeline_mode = #tpu.pipeline_mode<synchronous>, transform_indices = @transform_1, window_bounds = array<i64: 16, 96>}, {pipeline_mode = #tpu.pipeline_mode<synchronous>, transform_indices = @transform_2, window_bounds = array<i64: 1, 96>}, {pipeline_mode = #tpu.pipeline_mode<synchronous>, transform_indices = @transform_3, window_bounds = array<i64: 32, 32>}, {pipeline_mode = #tpu.pipeline_mode<synchronous>, transform_indices = @transform_4, window_bounds = array<i64: 1, 32>}, {transform_indices = @transform_5, window_bounds = array<i64: 16, 32>}]} {
    %c0 = arith.constant 0 : index
    %c0_0 = arith.constant 0 : index
    %0 = vector.load %arg1[%c0, %c0_0] : memref<16x16xf32, #tpu.memory_space<vmem>>, vector<16x16xf32>
    %c0_1 = arith.constant 0 : index
    %c0_2 = arith.constant 0 : index
    %1 = vector.load %arg2[%c0_1, %c0_2] : memref<16x96xf32, #tpu.memory_space<vmem>>, vector<16x96xf32>
    %cst = arith.constant dense<0.000000e+00> : vector<16x96xf32>
    %2 = tpu.matmul %0, %1, %cst {dimension_numbers = #tpu.dot_dimension_numbers<[1], [0], [0], [1], [0, 0, 1, 1], [], []>} : vector<16x16xf32>, vector<16x96xf32>, vector<16x96xf32> -> vector<16x96xf32>
    %c0_3 = arith.constant 0 : index
    %c0_4 = arith.constant 0 : index
    %3 = vector.load %arg3[%c0_3, %c0_4] : memref<1x96xf32, #tpu.memory_space<vmem>>, vector<1x96xf32>
    %4 = vector.broadcast %3 : vector<1x96xf32> to vector<16x96xf32>
    %5 = arith.addf %2, %4 : vector<16x96xf32>
    %6 = vector.extract_strided_slice %5 {offsets = [0, 0], sizes = [16, 32], strides = [1, 1]} : vector<16x96xf32> to vector<16x32xf32>
    %7 = vector.extract_strided_slice %5 {offsets = [0, 32], sizes = [16, 32], strides = [1, 1]} : vector<16x96xf32> to vector<16x32xf32>
    %cst_5 = arith.constant 0.176776692 : f32
    %8 = vector.broadcast %cst_5 : f32 to vector<16x32xf32>
    %9 = arith.mulf %7, %8 : vector<16x32xf32>
    %10 = vector.extract_strided_slice %5 {offsets = [0, 64], sizes = [16, 32], strides = [1, 1]} : vector<16x96xf32> to vector<16x32xf32>
    %11 = vector.extract_strided_slice %6 {offsets = [0, 0], sizes = [8, 4], strides = [1, 1]} : vector<16x32xf32> to vector<8x4xf32>
    %12 = vector.extract_strided_slice %9 {offsets = [0, 0], sizes = [8, 4], strides = [1, 1]} : vector<16x32xf32> to vector<8x4xf32>
    %13 = vector.extract_strided_slice %10 {offsets = [0, 0], sizes = [8, 4], strides = [1, 1]} : vector<16x32xf32> to vector<8x4xf32>
    %cst_6 = arith.constant dense<0.000000e+00> : vector<8x8xf32>
    %14 = tpu.matmul %11, %12, %cst_6 {dimension_numbers = #tpu.dot_dimension_numbers<[1], [1], [0], [0], [0, 0, 1, 0], [], []>} : vector<8x4xf32>, vector<8x4xf32>, vector<8x8xf32> -> vector<8x8xf32>
    %cst_7 = arith.constant dense<0xFF800000> : vector<8xf32>
    %15 = vector.multi_reduction <maximumf>, %14, %cst_7 [1] : vector<8x8xf32> to vector<8xf32>
    %16 = vector.shape_cast %15 : vector<8xf32> to vector<8x1xf32>
    %17 = vector.broadcast %16 : vector<8x1xf32> to vector<8x8xf32>
    %18 = arith.subf %14, %17 : vector<8x8xf32>
    %19 = math.exp %18 : vector<8x8xf32>
    %cst_8 = arith.constant dense<0.000000e+00> : vector<8x4xf32>
    %20 = tpu.matmul %19, %13, %cst_8 {dimension_numbers = #tpu.dot_dimension_numbers<[1], [0], [0], [1], [0, 0, 1, 1], [], []>} : vector<8x8xf32>, vector<8x4xf32>, vector<8x4xf32> -> vector<8x4xf32>
    %cst_9 = arith.constant dense<0.000000e+00> : vector<8xf32>
    %21 = vector.multi_reduction <add>, %19, %cst_9 [1] : vector<8x8xf32> to vector<8xf32>
    %22 = vector.shape_cast %21 : vector<8xf32> to vector<8x1xf32>
    %23 = tpu.reciprocal %22 {approx = true} : vector<8x1xf32> -> vector<8x1xf32>
    %24 = vector.broadcast %23 : vector<8x1xf32> to vector<8x4xf32>
    %25 = arith.mulf %20, %24 : vector<8x4xf32>
    %26 = arith.addf %11, %25 : vector<8x4xf32>
    %c0_10 = arith.constant 0 : index
    %c0_11 = arith.constant 0 : index
    %27 = vector.load %arg7[%c0_10, %c0_11] : memref<16x32xf32, #tpu.memory_space<vmem>>, vector<8x4xf32>
    tpu.vector_store %arg7[%c0_10, %c0_11], %26 {strides = array<i32>} : memref<16x32xf32, #tpu.memory_space<vmem>>, vector<8x4xf32>,
    %28 = vector.extract_strided_slice %6 {offsets = [0, 4], sizes = [8, 4], strides = [1, 1]} : vector<16x32xf32> to vector<8x4xf32>
    %29 = vector.extract_strided_slice %9 {offsets = [0, 4], sizes = [8, 4], strides = [1, 1]} : vector<16x32xf32> to vector<8x4xf32>
    %30 = vector.extract_strided_slice %10 {offsets = [0, 4], sizes = [8, 4], strides = [1, 1]} : vector<16x32xf32> to vector<8x4xf32>
    %cst_12 = arith.constant dense<0.000000e+00> : vector<8x8xf32>
    %31 = tpu.matmul %28, %29, %cst_12 {dimension_numbers = #tpu.dot_dimension_numbers<[1], [1], [0], [0], [0, 0, 1, 0], [], []>} : vector<8x4xf32>, vector<8x4xf32>, vector<8x8xf32> -> vector<8x8xf32>
    %cst_13 = arith.constant dense<0xFF800000> : vector<8xf32>
    %32 = vector.multi_reduction <maximumf>, %31, %cst_13 [1] : vector<8x8xf32> to vector<8xf32>
    %33 = vector.shape_cast %32 : vector<8xf32> to vector<8x1xf32>
    %34 = vector.broadcast %33 : vector<8x1xf32> to vector<8x8xf32>
    %35 = arith.subf %31, %34 : vector<8x8xf32>
    %36 = math.exp %35 : vector<8x8xf32>
    %cst_14 = arith.constant dense<0.000000e+00> : vector<8x4xf32>
    %37 = tpu.matmul %36, %30, %cst_14 {dimension_numbers = #tpu.dot_dimension_numbers<[1], [0], [0], [1], [0, 0, 1, 1], [], []>} : vector<8x8xf32>, vector<8x4xf32>, vector<8x4xf32> -> vector<8x4xf32>
    %cst_15 = arith.constant dense<0.000000e+00> : vector<8xf32>
    %38 = vector.multi_reduction <add>, %36, %cst_15 [1] : vector<8x8xf32> to vector<8xf32>
    %39 = vector.shape_cast %38 : vector<8xf32> to vector<8x1xf32>
    %40 = tpu.reciprocal %39 {approx = true} : vector<8x1xf32> -> vector<8x1xf32>
    %41 = vector.broadcast %40 : vector<8x1xf32> to vector<8x4xf32>
    %42 = arith.mulf %37, %41 : vector<8x4xf32>
    %43 = arith.addf %28, %42 : vector<8x4xf32>
    %c0_16 = arith.constant 0 : index
    %c4 = arith.constant 4 : index
    %44 = vector.load %arg7[%c0_16, %c4] : memref<16x32xf32, #tpu.memory_space<vmem>>, vector<8x4xf32>
    tpu.vector_store %arg7[%c0_16, %c4], %43 {strides = array<i32>} : memref<16x32xf32, #tpu.memory_space<vmem>>, vector<8x4xf32>,
    %45 = vector.extract_strided_slice %6 {offsets = [0, 8], sizes = [8, 4], strides = [1, 1]} : vector<16x32xf32> to vector<8x4xf32>
    %46 = vector.extract_strided_slice %9 {offsets = [0, 8], sizes = [8, 4], strides = [1, 1]} : vector<16x32xf32> to vector<8x4xf32>
    %47 = vector.extract_strided_slice %10 {offsets = [0, 8], sizes = [8, 4], strides = [1, 1]} : vector<16x32xf32> to vector<8x4xf32>
    %cst_17 = arith.constant dense<0.000000e+00> : vector<8x8xf32>
    %48 = tpu.matmul %45, %46, %cst_17 {dimension_numbers = #tpu.dot_dimension_numbers<[1], [1], [0], [0], [0, 0, 1, 0], [], []>} : vector<8x4xf32>, vector<8x4xf32>, vector<8x8xf32> -> vector<8x8xf32>
    %cst_18 = arith.constant dense<0xFF800000> : vector<8xf32>
    %49 = vector.multi_reduction <maximumf>, %48, %cst_18 [1] : vector<8x8xf32> to vector<8xf32>
    %50 = vector.shape_cast %49 : vector<8xf32> to vector<8x1xf32>
    %51 = vector.broadcast %50 : vector<8x1xf32> to vector<8x8xf32>
    %52 = arith.subf %48, %51 : vector<8x8xf32>
    %53 = math.exp %52 : vector<8x8xf32>
    %cst_19 = arith.constant dense<0.000000e+00> : vector<8x4xf32>
    %54 = tpu.matmul %53, %47, %cst_19 {dimension_numbers = #tpu.dot_dimension_numbers<[1], [0], [0], [1], [0, 0, 1, 1], [], []>} : vector<8x8xf32>, vector<8x4xf32>, vector<8x4xf32> -> vector<8x4xf32>
    %cst_20 = arith.constant dense<0.000000e+00> : vector<8xf32>
    %55 = vector.multi_reduction <add>, %53, %cst_20 [1] : vector<8x8xf32> to vector<8xf32>
    %56 = vector.shape_cast %55 : vector<8xf32> to vector<8x1xf32>
    %57 = tpu.reciprocal %56 {approx = true} : vector<8x1xf32> -> vector<8x1xf32>
    %58 = vector.broadcast %57 : vector<8x1xf32> to vector<8x4xf32>
    %59 = arith.mulf %54, %58 : vector<8x4xf32>
    %60 = arith.addf %45, %59 : vector<8x4xf32>
    %c0_21 = arith.constant 0 : index
    %c8 = arith.constant 8 : index
    %61 = vector.load %arg7[%c0_21, %c8] : memref<16x32xf32, #tpu.memory_space<vmem>>, vector<8x4xf32>
    tpu.vector_store %arg7[%c0_21, %c8], %60 {strides = array<i32>} : memref<16x32xf32, #tpu.memory_space<vmem>>, vector<8x4xf32>,
    %62 = vector.extract_strided_slice %6 {offsets = [0, 12], sizes = [8, 4], strides = [1, 1]} : vector<16x32xf32> to vector<8x4xf32>
    %63 = vector.extract_strided_slice %9 {offsets = [0, 12], sizes = [8, 4], strides = [1, 1]} : vector<16x32xf32> to vector<8x4xf32>
    %64 = vector.extract_strided_slice %10 {offsets = [0, 12], sizes = [8, 4], strides = [1, 1]} : vector<16x32xf32> to vector<8x4xf32>
    %cst_22 = arith.constant dense<0.000000e+00> : vector<8x8xf32>
    %65 = tpu.matmul %62, %63, %cst_22 {dimension_numbers = #tpu.dot_dimension_numbers<[1], [1], [0], [0], [0, 0, 1, 0], [], []>} : vector<8x4xf32>, vector<8x4xf32>, vector<8x8xf32> -> vector<8x8xf32>
    %cst_23 = arith.constant dense<0xFF800000> : vector<8xf32>
    %66 = vector.multi_reduction <maximumf>, %65, %cst_23 [1] : vector<8x8xf32> to vector<8xf32>
    %67 = vector.shape_cast %66 : vector<8xf32> to vector<8x1xf32>
    %68 = vector.broadcast %67 : vector<8x1xf32> to vector<8x8xf32>
    %69 = arith.subf %65, %68 : vector<8x8xf32>
    %70 = math.exp %69 : vector<8x8xf32>
    %cst_24 = arith.constant dense<0.000000e+00> : vector<8x4xf32>
    %71 = tpu.matmul %70, %64, %cst_24 {dimension_numbers = #tpu.dot_dimension_numbers<[1], [0], [0], [1], [0, 0, 1, 1], [], []>} : vector<8x8xf32>, vector<8x4xf32>, vector<8x4xf32> -> vector<8x4xf32>
    %cst_25 = arith.constant dense<0.000000e+00> : vector<8xf32>
    %72 = vector.multi_reduction <add>, %70, %cst_25 [1] : vector<8x8xf32> to vector<8xf32>
    %73 = vector.shape_cast %72 : vector<8xf32> to vector<8x1xf32>
    %74 = tpu.reciprocal %73 {approx = true} : vector<8x1xf32> -> vector<8x1xf32>
    %75 = vector.broadcast %74 : vector<8x1xf32> to vector<8x4xf32>
    %76 = arith.mulf %71, %75 : vector<8x4xf32>
    %77 = arith.addf %62, %76 : vector<8x4xf32>
    %c0_26 = arith.constant 0 : index
    %c12 = arith.constant 12 : index
    %78 = vector.load %arg7[%c0_26, %c12] : memref<16x32xf32, #tpu.memory_space<vmem>>, vector<8x4xf32>
    tpu.vector_store %arg7[%c0_26, %c12], %77 {strides = array<i32>} : memref<16x32xf32, #tpu.memory_space<vmem>>, vector<8x4xf32>,
    %79 = vector.extract_strided_slice %6 {offsets = [0, 16], sizes = [8, 4], strides = [1, 1]} : vector<16x32xf32> to vector<8x4xf32>
    %80 = vector.extract_strided_slice %9 {offsets = [0, 16], sizes = [8, 4], strides = [1, 1]} : vector<16x32xf32> to vector<8x4xf32>
    %81 = vector.extract_strided_slice %10 {offsets = [0, 16], sizes = [8, 4], strides = [1, 1]} : vector<16x32xf32> to vector<8x4xf32>
    %cst_27 = arith.constant dense<0.000000e+00> : vector<8x8xf32>
    %82 = tpu.matmul %79, %80, %cst_27 {dimension_numbers = #tpu.dot_dimension_numbers<[1], [1], [0], [0], [0, 0, 1, 0], [], []>} : vector<8x4xf32>, vector<8x4xf32>, vector<8x8xf32> -> vector<8x8xf32>
    %cst_28 = arith.constant dense<0xFF800000> : vector<8xf32>
    %83 = vector.multi_reduction <maximumf>, %82, %cst_28 [1] : vector<8x8xf32> to vector<8xf32>
    %84 = vector.shape_cast %83 : vector<8xf32> to vector<8x1xf32>
    %85 = vector.broadcast %84 : vector<8x1xf32> to vector<8x8xf32>
    %86 = arith.subf %82, %85 : vector<8x8xf32>
    %87 = math.exp %86 : vector<8x8xf32>
    %cst_29 = arith.constant dense<0.000000e+00> : vector<8x4xf32>
    %88 = tpu.matmul %87, %81, %cst_29 {dimension_numbers = #tpu.dot_dimension_numbers<[1], [0], [0], [1], [0, 0, 1, 1], [], []>} : vector<8x8xf32>, vector<8x4xf32>, vector<8x4xf32> -> vector<8x4xf32>
    %cst_30 = arith.constant dense<0.000000e+00> : vector<8xf32>
    %89 = vector.multi_reduction <add>, %87, %cst_30 [1] : vector<8x8xf32> to vector<8xf32>
    %90 = vector.shape_cast %89 : vector<8xf32> to vector<8x1xf32>
    %91 = tpu.reciprocal %90 {approx = true} : vector<8x1xf32> -> vector<8x1xf32>
    %92 = vector.broadcast %91 : vector<8x1xf32> to vector<8x4xf32>
    %93 = arith.mulf %88, %92 : vector<8x4xf32>
    %94 = arith.addf %79, %93 : vector<8x4xf32>
    %c0_31 = arith.constant 0 : index
    %c16 = arith.constant 16 : index
    %95 = vector.load %arg7[%c0_31, %c16] : memref<16x32xf32, #tpu.memory_space<vmem>>, vector<8x4xf32>
    tpu.vector_store %arg7[%c0_31, %c16], %94 {strides = array<i32>} : memref<16x32xf32, #tpu.memory_space<vmem>>, vector<8x4xf32>,
    %96 = vector.extract_strided_slice %6 {offsets = [0, 20], sizes = [8, 4], strides = [1, 1]} : vector<16x32xf32> to vector<8x4xf32>
    %97 = vector.extract_strided_slice %9 {offsets = [0, 20], sizes = [8, 4], strides = [1, 1]} : vector<16x32xf32> to vector<8x4xf32>
    %98 = vector.extract_strided_slice %10 {offsets = [0, 20], sizes = [8, 4], strides = [1, 1]} : vector<16x32xf32> to vector<8x4xf32>
    %cst_32 = arith.constant dense<0.000000e+00> : vector<8x8xf32>
    %99 = tpu.matmul %96, %97, %cst_32 {dimension_numbers = #tpu.dot_dimension_numbers<[1], [1], [0], [0], [0, 0, 1, 0], [], []>} : vector<8x4xf32>, vector<8x4xf32>, vector<8x8xf32> -> vector<8x8xf32>
    %cst_33 = arith.constant dense<0xFF800000> : vector<8xf32>
    %100 = vector.multi_reduction <maximumf>, %99, %cst_33 [1] : vector<8x8xf32> to vector<8xf32>
    %101 = vector.shape_cast %100 : vector<8xf32> to vector<8x1xf32>
    %102 = vector.broadcast %101 : vector<8x1xf32> to vector<8x8xf32>
    %103 = arith.subf %99, %102 : vector<8x8xf32>
    %104 = math.exp %103 : vector<8x8xf32>
    %cst_34 = arith.constant dense<0.000000e+00> : vector<8x4xf32>
    %105 = tpu.matmul %104, %98, %cst_34 {dimension_numbers = #tpu.dot_dimension_numbers<[1], [0], [0], [1], [0, 0, 1, 1], [], []>} : vector<8x8xf32>, vector<8x4xf32>, vector<8x4xf32> -> vector<8x4xf32>
    %cst_35 = arith.constant dense<0.000000e+00> : vector<8xf32>
    %106 = vector.multi_reduction <add>, %104, %cst_35 [1] : vector<8x8xf32> to vector<8xf32>
    %107 = vector.shape_cast %106 : vector<8xf32> to vector<8x1xf32>
    %108 = tpu.reciprocal %107 {approx = true} : vector<8x1xf32> -> vector<8x1xf32>
    %109 = vector.broadcast %108 : vector<8x1xf32> to vector<8x4xf32>
    %110 = arith.mulf %105, %109 : vector<8x4xf32>
    %111 = arith.addf %96, %110 : vector<8x4xf32>
    %c0_36 = arith.constant 0 : index
    %c20 = arith.constant 20 : index
    %112 = vector.load %arg7[%c0_36, %c20] : memref<16x32xf32, #tpu.memory_space<vmem>>, vector<8x4xf32>
    tpu.vector_store %arg7[%c0_36, %c20], %111 {strides = array<i32>} : memref<16x32xf32, #tpu.memory_space<vmem>>, vector<8x4xf32>,
    %113 = vector.extract_strided_slice %6 {offsets = [0, 24], sizes = [8, 4], strides = [1, 1]} : vector<16x32xf32> to vector<8x4xf32>
    %114 = vector.extract_strided_slice %9 {offsets = [0, 24], sizes = [8, 4], strides = [1, 1]} : vector<16x32xf32> to vector<8x4xf32>
    %115 = vector.extract_strided_slice %10 {offsets = [0, 24], sizes = [8, 4], strides = [1, 1]} : vector<16x32xf32> to vector<8x4xf32>
    %cst_37 = arith.constant dense<0.000000e+00> : vector<8x8xf32>
    %116 = tpu.matmul %113, %114, %cst_37 {dimension_numbers = #tpu.dot_dimension_numbers<[1], [1], [0], [0], [0, 0, 1, 0], [], []>} : vector<8x4xf32>, vector<8x4xf32>, vector<8x8xf32> -> vector<8x8xf32>
    %cst_38 = arith.constant dense<0xFF800000> : vector<8xf32>
    %117 = vector.multi_reduction <maximumf>, %116, %cst_38 [1] : vector<8x8xf32> to vector<8xf32>
    %118 = vector.shape_cast %117 : vector<8xf32> to vector<8x1xf32>
    %119 = vector.broadcast %118 : vector<8x1xf32> to vector<8x8xf32>
    %120 = arith.subf %116, %119 : vector<8x8xf32>
    %121 = math.exp %120 : vector<8x8xf32>
    %cst_39 = arith.constant dense<0.000000e+00> : vector<8x4xf32>
    %122 = tpu.matmul %121, %115, %cst_39 {dimension_numbers = #tpu.dot_dimension_numbers<[1], [0], [0], [1], [0, 0, 1, 1], [], []>} : vector<8x8xf32>, vector<8x4xf32>, vector<8x4xf32> -> vector<8x4xf32>
    %cst_40 = arith.constant dense<0.000000e+00> : vector<8xf32>
    %123 = vector.multi_reduction <add>, %121, %cst_40 [1] : vector<8x8xf32> to vector<8xf32>
    %124 = vector.shape_cast %123 : vector<8xf32> to vector<8x1xf32>
    %125 = tpu.reciprocal %124 {approx = true} : vector<8x1xf32> -> vector<8x1xf32>
    %126 = vector.broadcast %125 : vector<8x1xf32> to vector<8x4xf32>
    %127 = arith.mulf %122, %126 : vector<8x4xf32>
    %128 = arith.addf %113, %127 : vector<8x4xf32>
    %c0_41 = arith.constant 0 : index
    %c24 = arith.constant 24 : index
    %129 = vector.load %arg7[%c0_41, %c24] : memref<16x32xf32, #tpu.memory_space<vmem>>, vector<8x4xf32>
    tpu.vector_store %arg7[%c0_41, %c24], %128 {strides = array<i32>} : memref<16x32xf32, #tpu.memory_space<vmem>>, vector<8x4xf32>,
    %130 = vector.extract_strided_slice %6 {offsets = [0, 28], sizes = [8, 4], strides = [1, 1]} : vector<16x32xf32> to vector<8x4xf32>
    %131 = vector.extract_strided_slice %9 {offsets = [0, 28], sizes = [8, 4], strides = [1, 1]} : vector<16x32xf32> to vector<8x4xf32>
    %132 = vector.extract_strided_slice %10 {offsets = [0, 28], sizes = [8, 4], strides = [1, 1]} : vector<16x32xf32> to vector<8x4xf32>
    %cst_42 = arith.constant dense<0.000000e+00> : vector<8x8xf32>
    %133 = tpu.matmul %130, %131, %cst_42 {dimension_numbers = #tpu.dot_dimension_numbers<[1], [1], [0], [0], [0, 0, 1, 0], [], []>} : vector<8x4xf32>, vector<8x4xf32>, vector<8x8xf32> -> vector<8x8xf32>
    %cst_43 = arith.constant dense<0xFF800000> : vector<8xf32>
    %134 = vector.multi_reduction <maximumf>, %133, %cst_43 [1] : vector<8x8xf32> to vector<8xf32>
    %135 = vector.shape_cast %134 : vector<8xf32> to vector<8x1xf32>
    %136 = vector.broadcast %135 : vector<8x1xf32> to vector<8x8xf32>
    %137 = arith.subf %133, %136 : vector<8x8xf32>
    %138 = math.exp %137 : vector<8x8xf32>
    %cst_44 = arith.constant dense<0.000000e+00> : vector<8x4xf32>
    %139 = tpu.matmul %138, %132, %cst_44 {dimension_numbers = #tpu.dot_dimension_numbers<[1], [0], [0], [1], [0, 0, 1, 1], [], []>} : vector<8x8xf32>, vector<8x4xf32>, vector<8x4xf32> -> vector<8x4xf32>
    %cst_45 = arith.constant dense<0.000000e+00> : vector<8xf32>
    %140 = vector.multi_reduction <add>, %138, %cst_45 [1] : vector<8x8xf32> to vector<8xf32>
    %141 = vector.shape_cast %140 : vector<8xf32> to vector<8x1xf32>
    %142 = tpu.reciprocal %141 {approx = true} : vector<8x1xf32> -> vector<8x1xf32>
    %143 = vector.broadcast %142 : vector<8x1xf32> to vector<8x4xf32>
    %144 = arith.mulf %139, %143 : vector<8x4xf32>
    %145 = arith.addf %130, %144 : vector<8x4xf32>
    %c0_46 = arith.constant 0 : index
    %c28 = arith.constant 28 : index
    %146 = vector.load %arg7[%c0_46, %c28] : memref<16x32xf32, #tpu.memory_space<vmem>>, vector<8x4xf32>
    tpu.vector_store %arg7[%c0_46, %c28], %145 {strides = array<i32>} : memref<16x32xf32, #tpu.memory_space<vmem>>, vector<8x4xf32>,
    %147 = vector.extract_strided_slice %6 {offsets = [8, 0], sizes = [8, 4], strides = [1, 1]} : vector<16x32xf32> to vector<8x4xf32>
    %148 = vector.extract_strided_slice %9 {offsets = [8, 0], sizes = [8, 4], strides = [1, 1]} : vector<16x32xf32> to vector<8x4xf32>
    %149 = vector.extract_strided_slice %10 {offsets = [8, 0], sizes = [8, 4], strides = [1, 1]} : vector<16x32xf32> to vector<8x4xf32>
    %cst_47 = arith.constant dense<0.000000e+00> : vector<8x8xf32>
    %150 = tpu.matmul %147, %148, %cst_47 {dimension_numbers = #tpu.dot_dimension_numbers<[1], [1], [0], [0], [0, 0, 1, 0], [], []>} : vector<8x4xf32>, vector<8x4xf32>, vector<8x8xf32> -> vector<8x8xf32>
    %cst_48 = arith.constant dense<0xFF800000> : vector<8xf32>
    %151 = vector.multi_reduction <maximumf>, %150, %cst_48 [1] : vector<8x8xf32> to vector<8xf32>
    %152 = vector.shape_cast %151 : vector<8xf32> to vector<8x1xf32>
    %153 = vector.broadcast %152 : vector<8x1xf32> to vector<8x8xf32>
    %154 = arith.subf %150, %153 : vector<8x8xf32>
    %155 = math.exp %154 : vector<8x8xf32>
    %cst_49 = arith.constant dense<0.000000e+00> : vector<8x4xf32>
    %156 = tpu.matmul %155, %149, %cst_49 {dimension_numbers = #tpu.dot_dimension_numbers<[1], [0], [0], [1], [0, 0, 1, 1], [], []>} : vector<8x8xf32>, vector<8x4xf32>, vector<8x4xf32> -> vector<8x4xf32>
    %cst_50 = arith.constant dense<0.000000e+00> : vector<8xf32>
    %157 = vector.multi_reduction <add>, %155, %cst_50 [1] : vector<8x8xf32> to vector<8xf32>
    %158 = vector.shape_cast %157 : vector<8xf32> to vector<8x1xf32>
    %159 = tpu.reciprocal %158 {approx = true} : vector<8x1xf32> -> vector<8x1xf32>
    %160 = vector.broadcast %159 : vector<8x1xf32> to vector<8x4xf32>
    %161 = arith.mulf %156, %160 : vector<8x4xf32>
    %162 = arith.addf %147, %161 : vector<8x4xf32>
    %c8_51 = arith.constant 8 : index
    %c0_52 = arith.constant 0 : index
    %163 = vector.load %arg7[%c8_51, %c0_52] : memref<16x32xf32, #tpu.memory_space<vmem>>, vector<8x4xf32>
    tpu.vector_store %arg7[%c8_51, %c0_52], %162 {strides = array<i32>} : memref<16x32xf32, #tpu.memory_space<vmem>>, vector<8x4xf32>,
    %164 = vector.extract_strided_slice %6 {offsets = [8, 4], sizes = [8, 4], strides = [1, 1]} : vector<16x32xf32> to vector<8x4xf32>
    %165 = vector.extract_strided_slice %9 {offsets = [8, 4], sizes = [8, 4], strides = [1, 1]} : vector<16x32xf32> to vector<8x4xf32>
    %166 = vector.extract_strided_slice %10 {offsets = [8, 4], sizes = [8, 4], strides = [1, 1]} : vector<16x32xf32> to vector<8x4xf32>
    %cst_53 = arith.constant dense<0.000000e+00> : vector<8x8xf32>
    %167 = tpu.matmul %164, %165, %cst_53 {dimension_numbers = #tpu.dot_dimension_numbers<[1], [1], [0], [0], [0, 0, 1, 0], [], []>} : vector<8x4xf32>, vector<8x4xf32>, vector<8x8xf32> -> vector<8x8xf32>
    %cst_54 = arith.constant dense<0xFF800000> : vector<8xf32>
    %168 = vector.multi_reduction <maximumf>, %167, %cst_54 [1] : vector<8x8xf32> to vector<8xf32>
    %169 = vector.shape_cast %168 : vector<8xf32> to vector<8x1xf32>
    %170 = vector.broadcast %169 : vector<8x1xf32> to vector<8x8xf32>
    %171 = arith.subf %167, %170 : vector<8x8xf32>
    %172 = math.exp %171 : vector<8x8xf32>
    %cst_55 = arith.constant dense<0.000000e+00> : vector<8x4xf32>
    %173 = tpu.matmul %172, %166, %cst_55 {dimension_numbers = #tpu.dot_dimension_numbers<[1], [0], [0], [1], [0, 0, 1, 1], [], []>} : vector<8x8xf32>, vector<8x4xf32>, vector<8x4xf32> -> vector<8x4xf32>
    %cst_56 = arith.constant dense<0.000000e+00> : vector<8xf32>
    %174 = vector.multi_reduction <add>, %172, %cst_56 [1] : vector<8x8xf32> to vector<8xf32>
    %175 = vector.shape_cast %174 : vector<8xf32> to vector<8x1xf32>
    %176 = tpu.reciprocal %175 {approx = true} : vector<8x1xf32> -> vector<8x1xf32>
    %177 = vector.broadcast %176 : vector<8x1xf32> to vector<8x4xf32>
    %178 = arith.mulf %173, %177 : vector<8x4xf32>
    %179 = arith.addf %164, %178 : vector<8x4xf32>
    %c8_57 = arith.constant 8 : index
    %c4_58 = arith.constant 4 : index
    %180 = vector.load %arg7[%c8_57, %c4_58] : memref<16x32xf32, #tpu.memory_space<vmem>>, vector<8x4xf32>
    tpu.vector_store %arg7[%c8_57, %c4_58], %179 {strides = array<i32>} : memref<16x32xf32, #tpu.memory_space<vmem>>, vector<8x4xf32>,
    %181 = vector.extract_strided_slice %6 {offsets = [8, 8], sizes = [8, 4], strides = [1, 1]} : vector<16x32xf32> to vector<8x4xf32>
    %182 = vector.extract_strided_slice %9 {offsets = [8, 8], sizes = [8, 4], strides = [1, 1]} : vector<16x32xf32> to vector<8x4xf32>
    %183 = vector.extract_strided_slice %10 {offsets = [8, 8], sizes = [8, 4], strides = [1, 1]} : vector<16x32xf32> to vector<8x4xf32>
    %cst_59 = arith.constant dense<0.000000e+00> : vector<8x8xf32>
    %184 = tpu.matmul %181, %182, %cst_59 {dimension_numbers = #tpu.dot_dimension_numbers<[1], [1], [0], [0], [0, 0, 1, 0], [], []>} : vector<8x4xf32>, vector<8x4xf32>, vector<8x8xf32> -> vector<8x8xf32>
    %cst_60 = arith.constant dense<0xFF800000> : vector<8xf32>
    %185 = vector.multi_reduction <maximumf>, %184, %cst_60 [1] : vector<8x8xf32> to vector<8xf32>
    %186 = vector.shape_cast %185 : vector<8xf32> to vector<8x1xf32>
    %187 = vector.broadcast %186 : vector<8x1xf32> to vector<8x8xf32>
    %188 = arith.subf %184, %187 : vector<8x8xf32>
    %189 = math.exp %188 : vector<8x8xf32>
    %cst_61 = arith.constant dense<0.000000e+00> : vector<8x4xf32>
    %190 = tpu.matmul %189, %183, %cst_61 {dimension_numbers = #tpu.dot_dimension_numbers<[1], [0], [0], [1], [0, 0, 1, 1], [], []>} : vector<8x8xf32>, vector<8x4xf32>, vector<8x4xf32> -> vector<8x4xf32>
    %cst_62 = arith.constant dense<0.000000e+00> : vector<8xf32>
    %191 = vector.multi_reduction <add>, %189, %cst_62 [1] : vector<8x8xf32> to vector<8xf32>
    %192 = vector.shape_cast %191 : vector<8xf32> to vector<8x1xf32>
    %193 = tpu.reciprocal %192 {approx = true} : vector<8x1xf32> -> vector<8x1xf32>
    %194 = vector.broadcast %193 : vector<8x1xf32> to vector<8x4xf32>
    %195 = arith.mulf %190, %194 : vector<8x4xf32>
    %196 = arith.addf %181, %195 : vector<8x4xf32>
    %c8_63 = arith.constant 8 : index
    %c8_64 = arith.constant 8 : index
    %197 = vector.load %arg7[%c8_63, %c8_64] : memref<16x32xf32, #tpu.memory_space<vmem>>, vector<8x4xf32>
    tpu.vector_store %arg7[%c8_63, %c8_64], %196 {strides = array<i32>} : memref<16x32xf32, #tpu.memory_space<vmem>>, vector<8x4xf32>,
    %198 = vector.extract_strided_slice %6 {offsets = [8, 12], sizes = [8, 4], strides = [1, 1]} : vector<16x32xf32> to vector<8x4xf32>
    %199 = vector.extract_strided_slice %9 {offsets = [8, 12], sizes = [8, 4], strides = [1, 1]} : vector<16x32xf32> to vector<8x4xf32>
    %200 = vector.extract_strided_slice %10 {offsets = [8, 12], sizes = [8, 4], strides = [1, 1]} : vector<16x32xf32> to vector<8x4xf32>
    %cst_65 = arith.constant dense<0.000000e+00> : vector<8x8xf32>
    %201 = tpu.matmul %198, %199, %cst_65 {dimension_numbers = #tpu.dot_dimension_numbers<[1], [1], [0], [0], [0, 0, 1, 0], [], []>} : vector<8x4xf32>, vector<8x4xf32>, vector<8x8xf32> -> vector<8x8xf32>
    %cst_66 = arith.constant dense<0xFF800000> : vector<8xf32>
    %202 = vector.multi_reduction <maximumf>, %201, %cst_66 [1] : vector<8x8xf32> to vector<8xf32>
    %203 = vector.shape_cast %202 : vector<8xf32> to vector<8x1xf32>
    %204 = vector.broadcast %203 : vector<8x1xf32> to vector<8x8xf32>
    %205 = arith.subf %201, %204 : vector<8x8xf32>
    %206 = math.exp %205 : vector<8x8xf32>
    %cst_67 = arith.constant dense<0.000000e+00> : vector<8x4xf32>
    %207 = tpu.matmul %206, %200, %cst_67 {dimension_numbers = #tpu.dot_dimension_numbers<[1], [0], [0], [1], [0, 0, 1, 1], [], []>} : vector<8x8xf32>, vector<8x4xf32>, vector<8x4xf32> -> vector<8x4xf32>
    %cst_68 = arith.constant dense<0.000000e+00> : vector<8xf32>
    %208 = vector.multi_reduction <add>, %206, %cst_68 [1] : vector<8x8xf32> to vector<8xf32>
    %209 = vector.shape_cast %208 : vector<8xf32> to vector<8x1xf32>
    %210 = tpu.reciprocal %209 {approx = true} : vector<8x1xf32> -> vector<8x1xf32>
    %211 = vector.broadcast %210 : vector<8x1xf32> to vector<8x4xf32>
    %212 = arith.mulf %207, %211 : vector<8x4xf32>
    %213 = arith.addf %198, %212 : vector<8x4xf32>
    %c8_69 = arith.constant 8 : index
    %c12_70 = arith.constant 12 : index
    %214 = vector.load %arg7[%c8_69, %c12_70] : memref<16x32xf32, #tpu.memory_space<vmem>>, vector<8x4xf32>
    tpu.vector_store %arg7[%c8_69, %c12_70], %213 {strides = array<i32>} : memref<16x32xf32, #tpu.memory_space<vmem>>, vector<8x4xf32>,
    %215 = vector.extract_strided_slice %6 {offsets = [8, 16], sizes = [8, 4], strides = [1, 1]} : vector<16x32xf32> to vector<8x4xf32>
    %216 = vector.extract_strided_slice %9 {offsets = [8, 16], sizes = [8, 4], strides = [1, 1]} : vector<16x32xf32> to vector<8x4xf32>
    %217 = vector.extract_strided_slice %10 {offsets = [8, 16], sizes = [8, 4], strides = [1, 1]} : vector<16x32xf32> to vector<8x4xf32>
    %cst_71 = arith.constant dense<0.000000e+00> : vector<8x8xf32>
    %218 = tpu.matmul %215, %216, %cst_71 {dimension_numbers = #tpu.dot_dimension_numbers<[1], [1], [0], [0], [0, 0, 1, 0], [], []>} : vector<8x4xf32>, vector<8x4xf32>, vector<8x8xf32> -> vector<8x8xf32>
    %cst_72 = arith.constant dense<0xFF800000> : vector<8xf32>
    %219 = vector.multi_reduction <maximumf>, %218, %cst_72 [1] : vector<8x8xf32> to vector<8xf32>
    %220 = vector.shape_cast %219 : vector<8xf32> to vector<8x1xf32>
    %221 = vector.broadcast %220 : vector<8x1xf32> to vector<8x8xf32>
    %222 = arith.subf %218, %221 : vector<8x8xf32>
    %223 = math.exp %222 : vector<8x8xf32>
    %cst_73 = arith.constant dense<0.000000e+00> : vector<8x4xf32>
    %224 = tpu.matmul %223, %217, %cst_73 {dimension_numbers = #tpu.dot_dimension_numbers<[1], [0], [0], [1], [0, 0, 1, 1], [], []>} : vector<8x8xf32>, vector<8x4xf32>, vector<8x4xf32> -> vector<8x4xf32>
    %cst_74 = arith.constant dense<0.000000e+00> : vector<8xf32>
    %225 = vector.multi_reduction <add>, %223, %cst_74 [1] : vector<8x8xf32> to vector<8xf32>
    %226 = vector.shape_cast %225 : vector<8xf32> to vector<8x1xf32>
    %227 = tpu.reciprocal %226 {approx = true} : vector<8x1xf32> -> vector<8x1xf32>
    %228 = vector.broadcast %227 : vector<8x1xf32> to vector<8x4xf32>
    %229 = arith.mulf %224, %228 : vector<8x4xf32>
    %230 = arith.addf %215, %229 : vector<8x4xf32>
    %c8_75 = arith.constant 8 : index
    %c16_76 = arith.constant 16 : index
    %231 = vector.load %arg7[%c8_75, %c16_76] : memref<16x32xf32, #tpu.memory_space<vmem>>, vector<8x4xf32>
    tpu.vector_store %arg7[%c8_75, %c16_76], %230 {strides = array<i32>} : memref<16x32xf32, #tpu.memory_space<vmem>>, vector<8x4xf32>,
    %232 = vector.extract_strided_slice %6 {offsets = [8, 20], sizes = [8, 4], strides = [1, 1]} : vector<16x32xf32> to vector<8x4xf32>
    %233 = vector.extract_strided_slice %9 {offsets = [8, 20], sizes = [8, 4], strides = [1, 1]} : vector<16x32xf32> to vector<8x4xf32>
    %234 = vector.extract_strided_slice %10 {offsets = [8, 20], sizes = [8, 4], strides = [1, 1]} : vector<16x32xf32> to vector<8x4xf32>
    %cst_77 = arith.constant dense<0.000000e+00> : vector<8x8xf32>
    %235 = tpu.matmul %232, %233, %cst_77 {dimension_numbers = #tpu.dot_dimension_numbers<[1], [1], [0], [0], [0, 0, 1, 0], [], []>} : vector<8x4xf32>, vector<8x4xf32>, vector<8x8xf32> -> vector<8x8xf32>
    %cst_78 = arith.constant dense<0xFF800000> : vector<8xf32>
    %236 = vector.multi_reduction <maximumf>, %235, %cst_78 [1] : vector<8x8xf32> to vector<8xf32>
    %237 = vector.shape_cast %236 : vector<8xf32> to vector<8x1xf32>
    %238 = vector.broadcast %237 : vector<8x1xf32> to vector<8x8xf32>
    %239 = arith.subf %235, %238 : vector<8x8xf32>
    %240 = math.exp %239 : vector<8x8xf32>
    %cst_79 = arith.constant dense<0.000000e+00> : vector<8x4xf32>
    %241 = tpu.matmul %240, %234, %cst_79 {dimension_numbers = #tpu.dot_dimension_numbers<[1], [0], [0], [1], [0, 0, 1, 1], [], []>} : vector<8x8xf32>, vector<8x4xf32>, vector<8x4xf32> -> vector<8x4xf32>
    %cst_80 = arith.constant dense<0.000000e+00> : vector<8xf32>
    %242 = vector.multi_reduction <add>, %240, %cst_80 [1] : vector<8x8xf32> to vector<8xf32>
    %243 = vector.shape_cast %242 : vector<8xf32> to vector<8x1xf32>
    %244 = tpu.reciprocal %243 {approx = true} : vector<8x1xf32> -> vector<8x1xf32>
    %245 = vector.broadcast %244 : vector<8x1xf32> to vector<8x4xf32>
    %246 = arith.mulf %241, %245 : vector<8x4xf32>
    %247 = arith.addf %232, %246 : vector<8x4xf32>
    %c8_81 = arith.constant 8 : index
    %c20_82 = arith.constant 20 : index
    %248 = vector.load %arg7[%c8_81, %c20_82] : memref<16x32xf32, #tpu.memory_space<vmem>>, vector<8x4xf32>
    tpu.vector_store %arg7[%c8_81, %c20_82], %247 {strides = array<i32>} : memref<16x32xf32, #tpu.memory_space<vmem>>, vector<8x4xf32>,
    %249 = vector.extract_strided_slice %6 {offsets = [8, 24], sizes = [8, 4], strides = [1, 1]} : vector<16x32xf32> to vector<8x4xf32>
    %250 = vector.extract_strided_slice %9 {offsets = [8, 24], sizes = [8, 4], strides = [1, 1]} : vector<16x32xf32> to vector<8x4xf32>
    %251 = vector.extract_strided_slice %10 {offsets = [8, 24], sizes = [8, 4], strides = [1, 1]} : vector<16x32xf32> to vector<8x4xf32>
    %cst_83 = arith.constant dense<0.000000e+00> : vector<8x8xf32>
    %252 = tpu.matmul %249, %250, %cst_83 {dimension_numbers = #tpu.dot_dimension_numbers<[1], [1], [0], [0], [0, 0, 1, 0], [], []>} : vector<8x4xf32>, vector<8x4xf32>, vector<8x8xf32> -> vector<8x8xf32>
    %cst_84 = arith.constant dense<0xFF800000> : vector<8xf32>
    %253 = vector.multi_reduction <maximumf>, %252, %cst_84 [1] : vector<8x8xf32> to vector<8xf32>
    %254 = vector.shape_cast %253 : vector<8xf32> to vector<8x1xf32>
    %255 = vector.broadcast %254 : vector<8x1xf32> to vector<8x8xf32>
    %256 = arith.subf %252, %255 : vector<8x8xf32>
    %257 = math.exp %256 : vector<8x8xf32>
    %cst_85 = arith.constant dense<0.000000e+00> : vector<8x4xf32>
    %258 = tpu.matmul %257, %251, %cst_85 {dimension_numbers = #tpu.dot_dimension_numbers<[1], [0], [0], [1], [0, 0, 1, 1], [], []>} : vector<8x8xf32>, vector<8x4xf32>, vector<8x4xf32> -> vector<8x4xf32>
    %cst_86 = arith.constant dense<0.000000e+00> : vector<8xf32>
    %259 = vector.multi_reduction <add>, %257, %cst_86 [1] : vector<8x8xf32> to vector<8xf32>
    %260 = vector.shape_cast %259 : vector<8xf32> to vector<8x1xf32>
    %261 = tpu.reciprocal %260 {approx = true} : vector<8x1xf32> -> vector<8x1xf32>
    %262 = vector.broadcast %261 : vector<8x1xf32> to vector<8x4xf32>
    %263 = arith.mulf %258, %262 : vector<8x4xf32>
    %264 = arith.addf %249, %263 : vector<8x4xf32>
    %c8_87 = arith.constant 8 : index
    %c24_88 = arith.constant 24 : index
    %265 = vector.load %arg7[%c8_87, %c24_88] : memref<16x32xf32, #tpu.memory_space<vmem>>, vector<8x4xf32>
    tpu.vector_store %arg7[%c8_87, %c24_88], %264 {strides = array<i32>} : memref<16x32xf32, #tpu.memory_space<vmem>>, vector<8x4xf32>,
    %266 = vector.extract_strided_slice %6 {offsets = [8, 28], sizes = [8, 4], strides = [1, 1]} : vector<16x32xf32> to vector<8x4xf32>
    %267 = vector.extract_strided_slice %9 {offsets = [8, 28], sizes = [8, 4], strides = [1, 1]} : vector<16x32xf32> to vector<8x4xf32>
    %268 = vector.extract_strided_slice %10 {offsets = [8, 28], sizes = [8, 4], strides = [1, 1]} : vector<16x32xf32> to vector<8x4xf32>
    %cst_89 = arith.constant dense<0.000000e+00> : vector<8x8xf32>
    %269 = tpu.matmul %266, %267, %cst_89 {dimension_numbers = #tpu.dot_dimension_numbers<[1], [1], [0], [0], [0, 0, 1, 0], [], []>} : vector<8x4xf32>, vector<8x4xf32>, vector<8x8xf32> -> vector<8x8xf32>
    %cst_90 = arith.constant dense<0xFF800000> : vector<8xf32>
    %270 = vector.multi_reduction <maximumf>, %269, %cst_90 [1] : vector<8x8xf32> to vector<8xf32>
    %271 = vector.shape_cast %270 : vector<8xf32> to vector<8x1xf32>
    %272 = vector.broadcast %271 : vector<8x1xf32> to vector<8x8xf32>
    %273 = arith.subf %269, %272 : vector<8x8xf32>
    %274 = math.exp %273 : vector<8x8xf32>
    %cst_91 = arith.constant dense<0.000000e+00> : vector<8x4xf32>
    %275 = tpu.matmul %274, %268, %cst_91 {dimension_numbers = #tpu.dot_dimension_numbers<[1], [0], [0], [1], [0, 0, 1, 1], [], []>} : vector<8x8xf32>, vector<8x4xf32>, vector<8x4xf32> -> vector<8x4xf32>
    %cst_92 = arith.constant dense<0.000000e+00> : vector<8xf32>
    %276 = vector.multi_reduction <add>, %274, %cst_92 [1] : vector<8x8xf32> to vector<8xf32>
    %277 = vector.shape_cast %276 : vector<8xf32> to vector<8x1xf32>
    %278 = tpu.reciprocal %277 {approx = true} : vector<8x1xf32> -> vector<8x1xf32>
    %279 = vector.broadcast %278 : vector<8x1xf32> to vector<8x4xf32>
    %280 = arith.mulf %275, %279 : vector<8x4xf32>
    %281 = arith.addf %266, %280 : vector<8x4xf32>
    %c8_93 = arith.constant 8 : index
    %c28_94 = arith.constant 28 : index
    %282 = vector.load %arg7[%c8_93, %c28_94] : memref<16x32xf32, #tpu.memory_space<vmem>>, vector<8x4xf32>
    tpu.vector_store %arg7[%c8_93, %c28_94], %281 {strides = array<i32>} : memref<16x32xf32, #tpu.memory_space<vmem>>, vector<8x4xf32>,
    %c0_95 = arith.constant 0 : index
    %c0_96 = arith.constant 0 : index
    %283 = vector.load %arg7[%c0_95, %c0_96] : memref<16x32xf32, #tpu.memory_space<vmem>>, vector<16x32xf32>
    %c0_97 = arith.constant 0 : index
    %c0_98 = arith.constant 0 : index
    %284 = vector.load %arg4[%c0_97, %c0_98] : memref<32x32xf32, #tpu.memory_space<vmem>>, vector<32x32xf32>
    %cst_99 = arith.constant dense<0.000000e+00> : vector<16x32xf32>
    %285 = tpu.matmul %283, %284, %cst_99 {dimension_numbers = #tpu.dot_dimension_numbers<[1], [0], [0], [1], [0, 0, 1, 1], [], []>} : vector<16x32xf32>, vector<32x32xf32>, vector<16x32xf32> -> vector<16x32xf32>
    %c0_100 = arith.constant 0 : index
    %c0_101 = arith.constant 0 : index
    %286 = vector.load %arg5[%c0_100, %c0_101] : memref<1x32xf32, #tpu.memory_space<vmem>>, vector<1x32xf32>
    %287 = vector.broadcast %286 : vector<1x32xf32> to vector<16x32xf32>
    %288 = arith.addf %285, %287 : vector<16x32xf32>
    %cst_102 = arith.constant 0.000000e+00 : f32
    %289 = vector.broadcast %cst_102 : f32 to vector<16x32xf32>
    %290 = arith.maximumf %288, %289 : vector<16x32xf32>
    %291 = arith.addf %283, %290 : vector<16x32xf32>
    %c0_103 = arith.constant 0 : index
    %c0_104 = arith.constant 0 : index
    %292 = vector.load %arg6[%c0_103, %c0_104] : memref<16x32xf32, #tpu.memory_space<vmem>>, vector<16x32xf32>
    tpu.vector_store %arg6[%c0_103, %c0_104], %291 {strides = array<i32>} : memref<16x32xf32, #tpu.memory_space<vmem>>, vector<16x32xf32>,
    return
  }
  func.func @transform_0(%arg0: i32) -> (i32, i32) {
    %c0_i32 = arith.constant 0 : i32
    %c0_i32_0 = arith.constant 0 : i32
    return %arg0, %c0_i32 : i32, i32
  }
  func.func @transform_1(%arg0: i32) -> (i32, i32) {
    %c0_i32 = arith.constant 0 : i32
    %c0_i32_0 = arith.constant 0 : i32
    %c0_i32_1 = arith.constant 0 : i32
    return %c0_i32, %c0_i32_0 : i32, i32
  }
  func.func @transform_2(%arg0: i32) -> (i32, i32) {
    %c0_i32 = arith.constant 0 : i32
    %c0_i32_0 = arith.constant 0 : i32
    %c0_i32_1 = arith.constant 0 : i32
    return %c0_i32, %c0_i32_0 : i32, i32
  }
  func.func @transform_3(%arg0: i32) -> (i32, i32) {
    %c0_i32 = arith.constant 0 : i32
    %c0_i32_0 = arith.constant 0 : i32
    %c0_i32_1 = arith.constant 0 : i32
    return %c0_i32, %c0_i32_0 : i32, i32
  }
  func.func @transform_4(%arg0: i32) -> (i32, i32) {
    %c0_i32 = arith.constant 0 : i32
    %c0_i32_0 = arith.constant 0 : i32
    %c0_i32_1 = arith.constant 0 : i32
    return %c0_i32, %c0_i32_0 : i32, i32
  }
  func.func @transform_5(%arg0: i32) -> (i32, i32) {
    %c0_i32 = arith.constant 0 : i32
    %c0_i32_0 = arith.constant 0 : i32
    return %arg0, %c0_i32 : i32, i32
  }
}

</mosaic_0001>

<bundles_post_ra>
// kernel: tpu_custom_call.1
= control target key start
LH: loop header
LB: loop body
LE: loop exit
PB: predicated region body
PF: predicated region fallthrough
CT: control target
= control target key end

     0   :  { %10 = vsyncpa [#allocation4], 0  ;;  %s4038_s0 = inlined_call_operand.hbm [shape: f32[16,16], index: 0, kind: input, shape index: {}]   ;;  %s4039_s1 = inlined_call_operand.hbm [shape: f32[16,96], index: 1, kind: input, shape index: {}]   ;;  %s4040_s2 = inlined_call_operand.vmem [shape: f32[1,96], index: 2, kind: input, shape index: {}]   ;;  %s4041_s3 = inlined_call_operand.hbm [shape: f32[32,32], index: 3, kind: input, shape index: {}]   ;;  %s4042_s4 = inlined_call_operand.vmem [shape: f32[1,32], index: 4, kind: input, shape index: {}]   ;;  %s4043_s5 = inlined_call_operand.hbm [shape: f32[16,32], index: 5, kind: output, shape index: {}]  }
   0x1   :  { %11 = vsyncpa [#allocation7], 0 }
   0x2   :  { %12 = vsyncpa [#allocation5], 0  ;;  %s3526_s18 = smov [#allocation6]   ;;  %s3527_s20 = smov [#allocation3]  }
   0x3   :  { %s30_s19 = sshll.u32 %s3526_s18, 4  ;;  %s18_s21 = sshll.u32 %s3527_s20, 4  ;;  %s31_s19 = int_to_ptr.vmem [resolvable:$true] %s30_s19  ;;  %s3593_s21 = int_to_ptr.vmem [resolvable:$true] %s18_s21 }
   0x4   :  { %s3432_s24 = scalar_lea.hbm %s4039_s1, 256 }
   0x5   :  { %p3433_p0 = scmp.ne.s32.totalorder %s4039_s1, %s3432_s24  ;;  %p3436_p1 = scmp.lt.u32.totalorder %s3432_s24, %s4039_s1 }
   0x7   :  { %p3438_p2 = pnand %p3436_p1, %p3433_p0 }
   0x9   :  { %3441 = shalt.err (!%p3438_p2)
}
   0xa   :  { %s3442_s29 = scalar_lea.vmem %s31_s19, 256  ;;  %p3447_p4 = scmp.lt.s32.totalorder %s31_s19, %s31_s19 }
   0xb   :  { %p3443_p3 = scmp.ne.s32.totalorder %s31_s19, %s3442_s29  ;;  %p3448_p5 = scmp.lt.s32.totalorder %s3442_s29, %s3442_s29 }
   0xd   :  { %p3449_p6 = por %p3448_p5, %p3447_p4 }
   0xf   :  { %p3450_p7 = pnand %p3449_p6, %p3443_p3 }
  0x11   :  { %3453 = shalt.err (!%p3450_p7)
}
  0x12   :  { %s3528_s30 = smov 128   ;;  %s3529_s6 = smov 8  }
  0x13   :  { %36 = dma.hbm_to_vmem [thread:$0]  %s4039_s1, 256, %s31_s19, [#allocation7], %s3528_s30, %s3528_s30, %s3529_s6  }
  0x14   :  { %s3454_s11 = scalar_lea.hbm %s4038_s0, 256 }
  0x15   :  { %p3455_p8 = scmp.ne.s32.totalorder %s4038_s0, %s3454_s11  ;;  %p3458_p9 = scmp.lt.u32.totalorder %s3454_s11, %s4038_s0 }
  0x17   :  { %p3460_p10 = pnand %p3458_p9, %p3455_p8 }
  0x19   :  { %3463 = shalt.err (!%p3460_p10)
}
  0x1a   :  { %s3464_s16 = scalar_lea.vmem %s3593_s21, 256  ;;  %p3469_p12 = scmp.lt.s32.totalorder %s3593_s21, %s3593_s21 }
  0x1b   :  { %p3465_p11 = scmp.ne.s32.totalorder %s3593_s21, %s3464_s16  ;;  %p3470_p13 = scmp.lt.s32.totalorder %s3464_s16, %s3464_s16 }
  0x1d   :  { %p3471_p0 = por %p3470_p13, %p3469_p12 }
  0x1f   :  { %p3472_p1 = pnand %p3471_p0, %p3465_p11 }
  0x21   :  { %3475 = shalt.err (!%p3472_p1)
}
  0x22   :  { %24 = dma.hbm_to_vmem [thread:$0]  %s4038_s0, 256, %s3593_s21, [#allocation4], %s3528_s30, %s3528_s30, %s3529_s6  }
  0x23   :  { %s3530_s18 = smov [#allocation8]   ;;  %s3476_s23 = scalar_lea.hbm %s4041_s3, 512 }
  0x24   :  { %s44_s19 = sshll.u32 %s3530_s18, 4  ;;  %p3477_p2 = scmp.ne.s32.totalorder %s4041_s3, %s3476_s23  ;;  %s45_s19 = int_to_ptr.vmem [resolvable:$true] %s44_s19 }
  0x25   :  { %p3480_p3 = scmp.lt.u32.totalorder %s3476_s23, %s4041_s3 }
  0x27   :  { %p3482_p4 = pnand %p3480_p3, %p3477_p2 }
  0x29   :  { %3485 = shalt.err (!%p3482_p4)
}
  0x2a   :  { %s3486_s28 = scalar_lea.vmem %s45_s19, 512  ;;  %p3491_p6 = scmp.lt.s32.totalorder %s45_s19, %s45_s19 }
  0x2b   :  { %p3487_p5 = scmp.ne.s32.totalorder %s45_s19, %s3486_s28  ;;  %p3492_p7 = scmp.lt.s32.totalorder %s3486_s28, %s3486_s28 }
  0x2d   :  { %p3493_p8 = por %p3492_p7, %p3491_p6 }
  0x2f   :  { %p3494_p9 = pnand %p3493_p8, %p3487_p5 }
  0x31   :  { %3497 = shalt.err (!%p3494_p9)
}
  0x32   :  { %50 = dma.hbm_to_vmem [thread:$0]  %s4041_s3, 512, %s45_s19, [#allocation7], %s3528_s30, %s3528_s30, %s3529_s6  }
  0x33   :  { %3520 = dma.done.wait [#allocation4], 256  }
  0x34   :  { %3521 = vsyncadd [#allocation4], 4294967040 }
  0x35   :  { %3522 = dma.done.wait [#allocation7], 768  }
  0x36   :  { %3523 = vsyncadd [#allocation7], 4294966528  ;;  %vm73_vm0 = vcmask 130048   ;;  %v64_v0 = vld [vmem:[#allocation6] sm:$0xff]  ;;  %v65_v1 = vld [vmem:[#allocation6 + $0x8] sm:$0xff]  ;;  %v3531_v5 = vmov 0.0  }
  0x37   :  { %v62_v2 = vld [vmem:[#allocation3] sm:$0xff]  ;;  %v3319_v3 = vpack.c.bf16 %v65_v1, %v64_v0  ;;  %v63_v4 = vld [vmem:[#allocation3 + $0x8] sm:$0xff]  ;;  %3148 = vmatprep.subr.mxu1 %v3531_v5  ;;  %vm3532_vm1 = vmmov 0   ;;  %v3013_v6 = vld [vmem:[%s4040_s2] ss:$0 sm:$0xff]  ;;  %s3533_s7 = smov 124  }
  0x38   :  { %3145 = vmatprep.mubr.msk.f32.mxu0 %vm73_vm0, %v62_v2  ;;  %3150 = vmatprep.mubr.msk.f32.mxu1 %vm3532_vm1, %v3531_v5  ;;  %s3534_s8 = smov 96   ;;  %s3535_s9 = smov 92   ;;  %vm160_vm2 = vcmask 31744   ;;  %vm236_vm3 = vcmask 64512   ;;  %vm496_vm4 = vcmask 64544   ;;  %vm668_vm5 = vcmask 97344  }
  0x39   :  { %3320 = vmatprep.subr.bf16.mxu0 %v3319_v3  ;;  %s3536_s2 = smov 120   ;;  %s3537_s10 = smov 116   ;;  %vm840_vm6 = vcmask 130144   ;;  %vm1012_vm7 = vcmask 162944   ;;  %vm1184_vm8 = vcmask 195744   ;;  %vm1356_vm9 = vcmask 228544  }
  0x3a   :  { %3322 = vmatpush3.bf16.msra.mxu0 %v3319_v3  ;;  %s3538_s11 = smov 88   ;;  %s3539_s12 = smov 112   ;;  %vm1528_vm10 = vcmask 261344   ;;  %vm2907_vm11 = vcmask 261120  }
  0x3b   :  { %3153 = vmatprep.subr.mxu0 %v3531_v5  ;;  %s3540_s13 = smov 108   ;;  %s3541_s14 = smov 104  }
  0x3c   :  { %s3542_s15 = smov 84   ;;  %s3543_s16 = smov 100  }
  0x3d   :  { %3146 = vmatmul.mubr.msk.f32.vlgmr.msra.gmra.mrb[0].mxu0 %vm73_vm0, %v63_v4  ;;  %s3544_s1 = smov 80   ;;  %s3545_s17 = smov 76  }
  0x3e   :  { %3155 = vmatprep.mubr.msk.f32.mxu0 %vm3532_vm1, %v3531_v5  ;;  %s3546_s18 = smov 60   ;;  %s3547_s19 = smov 72  }
  0x3f   :  { %s3548_s20 = smov 48   ;;  %s3549_s22 = smov 68  }
  0x40   :  { %s3550_s23 = smov 44   ;;  %s3551_s24 = smov 64  }
  0x41   :  { %s3552_s25 = smov 56   ;;  %s3553_s26 = smov 52  }
  0x42   :  { %s3554_s27 = smov 40   ;;  %s3555_s28 = smov 36  }
  0x43   :  { %s3556_s0 = smov 4   ;;  %s3557_s21 = smov 12  }
  0x44   :  { %s3558_s3 = smov 16   ;;  %s3559_s29 = smov 20  }
 0x110   :  { %v3147_v7 = vpop.f32.mrb[0].mxu0 }
 0x111   :  { %v146_v8 = vpop.f32.mrb[1].mxu0  ;;  %v3654_v9 = vadd.f32 %v3147_v7, %v3013_v6 }
 0x112   :  { %v3656_v10 = vadd.f32 %v3013_v6, %v146_v8 }
 0x113   :  { %v156_v12 = vmul.f32 0.17677669, %v3654_v9 }
 0x114   :  { %326 = vrot.lane.b32.xlu1 %v3656_v10, %s3533_s7  ;;  %v155_v11 = vmul.f32 0.17677669, %v3656_v10 }
 0x116   :  { %158 = vrot.lane.b32.xlu0 %v155_v11, %s3534_s8 }
 0x118   :  { %1531 = vrot.lane.b32.xlu1 %v156_v12, %s3534_s8  ;;  %s3561_s8 = smov 28  }
 0x11a   :  { %328 = vrot.lane.b32.xlu0 %v155_v11, %s3535_s9 }
 0x11c   :  { %1699 = vrot.lane.b32.xlu1 %v156_v12, %s3535_s9 }
 0x11e   :  { %498 = vrot.lane.b32.xlu0 %v3656_v10, %s3536_s2 }
 0x120   :  { %1697 = vrot.lane.b32.xlu1 %v3654_v9, %s3533_s7  ;;  %s3560_s7 = smov 24  }
 0x122   :  { %670 = vrot.lane.b32.xlu0 %v3656_v10, %s3537_s10 }
 0x124   :  { %1870 = vrot.lane.b32.xlu1 %v156_v12, %s3538_s11 }
 0x126   :  { %842 = vrot.lane.b32.xlu0 %v3656_v10, %s3539_s12 }
 0x128   :  { %1868 = vrot.lane.b32.xlu1 %v3654_v9, %s3536_s2 }
 0x12a   :  { %1014 = vrot.lane.b32.xlu0 %v3656_v10, %s3540_s13 }
 0x12c   :  { %500 = vrot.lane.b32.xlu1 %v155_v11, %s3538_s11 }
 0x12e   :  { %1186 = vrot.lane.b32.xlu0 %v3656_v10, %s3541_s14 }
 0x130   :  { %672 = vrot.lane.b32.xlu1 %v155_v11, %s3542_s15 }
 0x132   :  { %1358 = vrot.lane.b32.xlu0 %v3656_v10, %s3543_s16 }
 0x134   :  { %844 = vrot.lane.b32.xlu1 %v155_v11, %s3544_s1 }
 0x136   :  { %2383 = vrot.lane.b32.xlu0 %v156_v12, %s3545_s17 }
 0x138   :  { %1016 = vrot.lane.b32.xlu1 %v155_v11, %s3545_s17 }
 0x13a   :  { %410 = vrot.lane.b32.xlu0 %v3656_v10, %s3546_s18 }
 0x13c   :  { %1188 = vrot.lane.b32.xlu1 %v155_v11, %s3547_s19 }
 0x13e   :  { %926 = vrot.lane.b32.xlu0 %v3656_v10, %s3548_s20 }
 0x140   :  { %1360 = vrot.lane.b32.xlu1 %v155_v11, %s3549_s22 }
 0x142   :  { %1098 = vrot.lane.b32.xlu0 %v3656_v10, %s3550_s23 }
 0x144   :  { %2041 = vrot.lane.b32.xlu1 %v156_v12, %s3542_s15 }
 0x148   :  { %2039 = vrot.lane.b32.xlu1 %v3654_v9, %s3537_s10  ;;  %s3562_s10 = smov [#allocation9]  }
 0x149   :  { %s3000_s11 = sshll.u32 %s3562_s10, 4  ;;  %s3001_s11 = int_to_ptr.vmem [resolvable:$true] %s3000_s11 }
 0x14a   :  { %p3503_p11 = scmp.lt.s32.totalorder %s3001_s11, %s3001_s11 }
 0x14c   :  { %2212 = vrot.lane.b32.xlu1 %v156_v12, %s3544_s1 }
 0x150   :  { %2210 = vrot.lane.b32.xlu1 %v3654_v9, %s3539_s12  ;;  %s3498_s12 = scalar_lea.vmem %s3001_s11, 256 }
 0x151   :  { %p3499_p10 = scmp.ne.s32.totalorder %s3001_s11, %s3498_s12  ;;  %p3504_p12 = scmp.lt.s32.totalorder %s3498_s12, %s3498_s12 }
 0x153   :  { %p3505_p13 = por %p3504_p12, %p3503_p11 }
 0x154   :  { %2381 = vrot.lane.b32.xlu1 %v3654_v9, %s3540_s13 }
 0x155   :  { %p3506_p0 = pnand %p3505_p13, %p3499_p10 }
 0x158   :  { %2554 = vrot.lane.b32.xlu1 %v156_v12, %s3547_s19 }
 0x15c   :  { %2552 = vrot.lane.b32.xlu1 %v3654_v9, %s3541_s14 }
 0x160   :  { %2725 = vrot.lane.b32.xlu1 %v156_v12, %s3549_s22 }
 0x164   :  { %2723 = vrot.lane.b32.xlu1 %v3654_v9, %s3543_s16 }
 0x168   :  { %243 = vrot.lane.b32.xlu1 %v3656_v10, %s3551_s24 }
 0x16c   :  { %582 = vrot.lane.b32.xlu1 %v3656_v10, %s3552_s25 }
 0x170   :  { %754 = vrot.lane.b32.xlu1 %v3656_v10, %s3553_s26 }
 0x174   :  { %1270 = vrot.lane.b32.xlu1 %v3656_v10, %s3554_s27 }
 0x178   :  { %1442 = vrot.lane.b32.xlu1 %v3656_v10, %s3555_s28 }
 0x186   :  { %v327_v13 = vpop.permute.xlu1 %326 }
 0x188   :  { %v159_v14 = vpop.permute.xlu0 %158 }
 0x189   :  { %3149 = vmatpush3.xpose.msk.msra.mxu1 %vm160_vm2, %v159_v14 }
 0x18a   :  { %v1532_v15 = vpop.permute.xlu1 %1531  ;;  %3158 = vmatprep.subr.mxu1 %v3531_v5 }
 0x18c   :  { %3151 = vmatmul.mubr.msk.f32.vlgmr.msra.gmra.mrb[0].mxu1 %vm160_vm2, %v3656_v10  ;;  %v329_v16 = vpop.permute.xlu0 %328 }
 0x18d   :  { %3159 = vmatpush3.xpose.msk.msra.mxu1 %vm160_vm2, %v329_v16  ;;  %3160 = vmatprep.mubr.msk.f32.mxu1 %vm3532_vm1, %v3531_v5 }
 0x18e   :  { %v1700_v17 = vpop.permute.xlu1 %1699  ;;  %3168 = vmatprep.subr.mxu1 %v3531_v5 }
 0x190   :  { %3161 = vmatmul.mubr.msk.f32.vlgmr.msra.gmra.mrb[2].mxu1 %vm160_vm2, %v327_v13  ;;  %v499_v20 = vpop.permute.xlu0 %498 }
 0x191   :  { %3170 = vmatprep.mubr.msk.f32.mxu1 %vm3532_vm1, %v3531_v5 }
 0x192   :  { %v1698_v18 = vpop.permute.xlu1 %1697 }
 0x194   :  { %v671_v22 = vpop.permute.xlu0 %670 }
 0x196   :  { %v1871_v19 = vpop.permute.xlu1 %1870 }
 0x198   :  { %v843_v25 = vpop.permute.xlu0 %842 }
 0x19a   :  { %v1869_v21 = vpop.permute.xlu1 %1868 }
 0x19c   :  { %v1015_v27 = vpop.permute.xlu0 %1014 }
 0x19e   :  { %v501_v23 = vpop.permute.xlu1 %500 }
 0x19f   :  { %3169 = vmatpush3.xpose.msk.msra.mxu1 %vm160_vm2, %v501_v23 }
 0x1a0   :  { %3178 = vmatprep.subr.mxu1 %v3531_v5  ;;  %v1187_v30 = vpop.permute.xlu0 %1186 }
 0x1a2   :  { %v673_v24 = vpop.permute.xlu1 %672  ;;  %3171 = vmatmul.mubr.msk.f32.vlgmr.msra.gmra.mrb[4].mxu1 %vm160_vm2, %v499_v20 }
 0x1a3   :  { %3179 = vmatpush3.xpose.msk.msra.mxu1 %vm160_vm2, %v673_v24  ;;  %3180 = vmatprep.mubr.msk.f32.mxu1 %vm3532_vm1, %v3531_v5 }
 0x1a4   :  { %3188 = vmatprep.subr.mxu1 %v3531_v5  ;;  %v1359_v32 = vpop.permute.xlu0 %1358 }
 0x1a6   :  { %v845_v26 = vpop.permute.xlu1 %844  ;;  %3181 = vmatmul.mubr.msk.f32.vlgmr.msra.gmra.mrb[6].mxu1 %vm160_vm2, %v671_v22 }
 0x1a7   :  { %3189 = vmatpush3.xpose.msk.msra.mxu1 %vm160_vm2, %v845_v26  ;;  %3190 = vmatprep.mubr.msk.f32.mxu1 %vm3532_vm1, %v3531_v5 }
 0x1a8   :  { %3198 = vmatprep.subr.mxu1 %v3531_v5  ;;  %v2384_v38 = vpop.permute.xlu0 %2383 }
 0x1aa   :  { %v1017_v28 = vpop.permute.xlu1 %1016  ;;  %3191 = vmatmul.mubr.msk.f32.vlgmr.msra.gmra.mrb[8].mxu1 %vm160_vm2, %v843_v25 }
 0x1ab   :  { %3199 = vmatpush3.xpose.msk.msra.mxu1 %vm160_vm2, %v1017_v28  ;;  %3200 = vmatprep.mubr.msk.f32.mxu1 %vm3532_vm1, %v3531_v5 }
 0x1ac   :  { %3208 = vmatprep.subr.mxu1 %v3531_v5 }
 0x1ae   :  { %v1189_v29 = vpop.permute.xlu1 %1188  ;;  %3201 = vmatmul.mubr.msk.f32.vlgmr.msra.gmra.mrb[10].mxu1 %vm160_vm2, %v1015_v27 }
 0x1af   :  { %3209 = vmatpush3.xpose.msk.msra.mxu1 %vm160_vm2, %v1189_v29  ;;  %3210 = vmatprep.mubr.msk.f32.mxu1 %vm3532_vm1, %v3531_v5 }
 0x1b0   :  { %3218 = vmatprep.subr.mxu1 %v3531_v5 }
 0x1b2   :  { %v1361_v31 = vpop.permute.xlu1 %1360  ;;  %3211 = vmatmul.mubr.msk.f32.vlgmr.msra.gmra.mrb[12].mxu1 %vm160_vm2, %v1187_v30  ;;  %v411_v30 = vpop.permute.xlu0 %410 }
 0x1b3   :  { %3219 = vmatpush3.xpose.msk.msra.mxu1 %vm160_vm2, %v1361_v31  ;;  %3220 = vmatprep.mubr.msk.f32.mxu1 %vm3532_vm1, %v3531_v5 }
 0x1b4   :  { %3228 = vmatprep.subr.mxu1 %v3531_v5 }
 0x1b6   :  { %v2042_v33 = vpop.permute.xlu1 %2041  ;;  %3221 = vmatmul.mubr.msk.f32.vlgmr.msra.gmra.mrb[14].mxu1 %vm160_vm2, %v1359_v32  ;;  %v3846_v32 = vpop.permute.xlu0 %926 }
 0x1b7   :  { %3229 = vmatpush3.xpose.msk.msra.mxu1 %vm160_vm2, %v1532_v15  ;;  %3230 = vmatprep.mubr.msk.f32.mxu1 %vm3532_vm1, %v3531_v5 }
 0x1b8   :  { %3238 = vmatprep.subr.mxu1 %v3531_v5 }
 0x1ba   :  { %v2040_v34 = vpop.permute.xlu1 %2039  ;;  %3231 = vmatmul.mubr.msk.f32.vlgmr.msra.gmra.mrb[16].mxu1 %vm160_vm2, %v3654_v9 }
 0x1bb   :  { %3239 = vmatpush3.xpose.msk.msra.mxu1 %vm160_vm2, %v1700_v17  ;;  %3240 = vmatprep.mubr.msk.f32.mxu1 %vm3532_vm1, %v3531_v5 }
 0x1bc   :  { %3248 = vmatprep.subr.mxu1 %v3531_v5 }
 0x1be   :  { %v2213_v35 = vpop.permute.xlu1 %2212  ;;  %3241 = vmatmul.mubr.msk.f32.vlgmr.msra.gmra.mrb[18].mxu1 %vm160_vm2, %v1698_v18 }
 0x1bf   :  { %3249 = vmatpush3.xpose.msk.msra.mxu1 %vm160_vm2, %v1871_v19  ;;  %3250 = vmatprep.mubr.msk.f32.mxu1 %vm3532_vm1, %v3531_v5 }
 0x1c0   :  { %3258 = vmatprep.subr.mxu1 %v3531_v5 }
 0x1c2   :  { %v2211_v36 = vpop.permute.xlu1 %2210  ;;  %3251 = vmatmul.mubr.msk.f32.vlgmr.msra.gmra.mrb[20].mxu1 %vm160_vm2, %v1869_v21 }
 0x1c3   :  { %3259 = vmatpush3.xpose.msk.msra.mxu1 %vm160_vm2, %v2042_v33  ;;  %3260 = vmatprep.mubr.msk.f32.mxu1 %vm3532_vm1, %v3531_v5 }
 0x1c4   :  { %3268 = vmatprep.subr.mxu1 %v3531_v5 }
 0x1c6   :  { %v2382_v37 = vpop.permute.xlu1 %2381  ;;  %3261 = vmatmul.mubr.msk.f32.vlgmr.msra.gmra.mrb[22].mxu1 %vm160_vm2, %v2040_v34 }
 0x1c7   :  { %3269 = vmatpush3.xpose.msk.msra.mxu1 %vm160_vm2, %v2213_v35  ;;  %3270 = vmatprep.mubr.msk.f32.mxu1 %vm3532_vm1, %v3531_v5  ;;  %v3852_v35 = vpop.permute.xlu0 %1098 }
 0x1c8   :  { %3278 = vmatprep.subr.mxu1 %v3531_v5 }
 0x1ca   :  { %v2555_v39 = vpop.permute.xlu1 %2554  ;;  %3271 = vmatmul.mubr.msk.f32.vlgmr.msra.gmra.mrb[24].mxu1 %vm160_vm2, %v2211_v36 }
 0x1cb   :  { %3279 = vmatpush3.xpose.msk.msra.mxu1 %vm160_vm2, %v2384_v38  ;;  %3280 = vmatprep.mubr.msk.f32.mxu1 %vm3532_vm1, %v3531_v5 }
 0x1cc   :  { %3288 = vmatprep.subr.mxu1 %v3531_v5 }
 0x1ce   :  { %v2553_v40 = vpop.permute.xlu1 %2552  ;;  %3281 = vmatmul.mubr.msk.f32.vlgmr.msra.gmra.mrb[26].mxu1 %vm160_vm2, %v2382_v37 }
 0x1cf   :  { %3289 = vmatpush3.xpose.msk.msra.mxu1 %vm160_vm2, %v2555_v39  ;;  %3290 = vmatprep.mubr.msk.f32.mxu1 %vm3532_vm1, %v3531_v5 }
 0x1d0   :  { %3298 = vmatprep.subr.mxu1 %v3531_v5 }
 0x1d2   :  { %v2726_v41 = vpop.permute.xlu1 %2725  ;;  %3291 = vmatmul.mubr.msk.f32.vlgmr.msra.gmra.mrb[28].mxu1 %vm160_vm2, %v2553_v40 }
 0x1d3   :  { %3299 = vmatpush3.xpose.msk.msra.mxu1 %vm160_vm2, %v2726_v41  ;;  %3300 = vmatprep.mubr.msk.f32.mxu1 %vm3532_vm1, %v3531_v5 }
 0x1d6   :  { %v2724_v42 = vpop.permute.xlu1 %2723 }
 0x1d7   :  { %3301 = vmatmul.mubr.msk.f32.vlgmr.msra.gmra.mrb[30].mxu1 %vm160_vm2, %v2724_v42 }
 0x1da   :  { %v244_v43 = vpop.permute.xlu1 %243 }
 0x1db   :  { %3154 = vmatpush3.msra.mxu0 %v244_v43 }
 0x1dc   :  { %3163 = vmatprep.subr.mxu0 %v3531_v5 }
 0x1de   :  { %v583_v29 = vpop.permute.xlu1 %582 }
 0x1e2   :  { %v755_v31 = vpop.permute.xlu1 %754 }
 0x1e6   :  { %v3850_v34 = vpop.permute.xlu1 %1270 }
 0x1ea   :  { %v3856_v37 = vpop.permute.xlu1 %1442 }
 0x25f   :  { %v3774_v44 = vpop.f32.mrb[0].mxu1 }
 0x260   :  { %v3152_v45 = vpop.f32.mrb[1].mxu1  ;;  %v237_v46 = vsel %vm236_vm3, %v3774_v44, -inf }
 0x261   :  { %238 = vmax.xlane.f32.xlu0 %v237_v46 }
 0x263   :  { %v3778_v47 = vpop.f32.mrb[2].mxu1 }
 0x264   :  { %v3162_v48 = vpop.f32.mrb[3].mxu1  ;;  %v404_v49 = vsel %vm236_vm3, %v3778_v47, -inf }
 0x265   :  { %405 = vmax.xlane.f32.xlu1 %v404_v49 }
 0x275   :  { %v3782_v50 = vpop.f32.mrb[4].mxu1 }
 0x276   :  { %1781 = vrot.lane.b32.xlu1 %v3654_v9, %s3546_s18  ;;  %v3172_v51 = vpop.f32.mrb[5].mxu1  ;;  %v576_v52 = vsel %vm236_vm3, %v3782_v50, -inf }
 0x277   :  { %577 = vmax.xlane.f32.xlu0 %v576_v52 }
 0x279   :  { %v3788_v53 = vpop.f32.mrb[6].mxu1 }
 0x27a   :  { %1952 = vrot.lane.b32.xlu1 %v3654_v9, %s3552_s25  ;;  %v3182_v54 = vpop.f32.mrb[7].mxu1  ;;  %v748_v13 = vsel %vm236_vm3, %v3788_v53, -inf }
 0x27d   :  { %v3792_v55 = vpop.f32.mrb[8].mxu1 }
 0x27e   :  { %2123 = vrot.lane.b32.xlu1 %v3654_v9, %s3553_s26  ;;  %v3192_v56 = vpop.f32.mrb[9].mxu1  ;;  %v920_v16 = vsel %vm236_vm3, %v3792_v55, -inf }
 0x281   :  { %v3796_v57 = vpop.f32.mrb[10].mxu1 }
 0x282   :  { %v3202_v58 = vpop.f32.mrb[11].mxu1  ;;  %v1092_v18 = vsel %vm236_vm3, %v3796_v57, -inf }
 0x285   :  { %v3798_v59 = vpop.f32.mrb[12].mxu1 }
 0x286   :  { %v3212_v60 = vpop.f32.mrb[13].mxu1  ;;  %v1264_v22 = vsel %vm236_vm3, %v3798_v59, -inf }
 0x289   :  { %v3800_v61 = vpop.f32.mrb[14].mxu1 }
 0x28a   :  { %v3222_v62 = vpop.f32.mrb[15].mxu1  ;;  %v1436_v24 = vsel %vm236_vm3, %v3800_v61, -inf }
 0x28d   :  { %1614 = vrot.lane.b32.xlu0 %v3654_v9, %s3551_s24  ;;  %v3804_v63 = vpop.f32.mrb[16].mxu1 }
 0x28e   :  { %v3232_v0 = vpop.f32.mrb[17].mxu1  ;;  %v1608_v21 = vsel %vm236_vm3, %v3804_v63, -inf }
 0x291   :  { %v3806_v1 = vpop.f32.mrb[18].mxu1 }
 0x292   :  { %v3242_v2 = vpop.f32.mrb[19].mxu1  ;;  %v1775_v23 = vsel %vm236_vm3, %v3806_v1, -inf }
 0x295   :  { %v3808_v3 = vpop.f32.mrb[20].mxu1 }
 0x296   :  { %v3252_v4 = vpop.f32.mrb[21].mxu1  ;;  %v1946_v25 = vsel %vm236_vm3, %v3808_v3, -inf }
 0x299   :  { %v3810_v6 = vpop.f32.mrb[22].mxu1 }
 0x29a   :  { %v3262_v7 = vpop.f32.mrb[23].mxu1  ;;  %v2117_v26 = vsel %vm236_vm3, %v3810_v6, -inf }
 0x29d   :  { %v3812_v8 = vpop.f32.mrb[24].mxu1 }
 0x29e   :  { %v3272_v11 = vpop.f32.mrb[25].mxu1  ;;  %v2288_v33 = vsel %vm236_vm3, %v3812_v8, -inf }
 0x2a1   :  { %v3814_v12 = vpop.f32.mrb[26].mxu1 }
 0x2a2   :  { %749 = vmax.xlane.f32.xlu1 %v748_v13  ;;  %v3282_v14 = vpop.f32.mrb[27].mxu1  ;;  %v2459_v27 = vsel %vm236_vm3, %v3814_v12, -inf }
 0x2a5   :  { %v3818_v15 = vpop.f32.mrb[28].mxu1 }
 0x2a6   :  { %921 = vmax.xlane.f32.xlu1 %v920_v16  ;;  %v3292_v17 = vpop.f32.mrb[29].mxu1  ;;  %v2630_v36 = vsel %vm236_vm3, %v3818_v15, -inf }
 0x2aa   :  { %1093 = vmax.xlane.f32.xlu1 %v1092_v18  ;;  %v3824_v19 = vpop.f32.mrb[30].mxu1 }
 0x2ab   :  { %v3302_v20 = vpop.f32.mrb[31].mxu1  ;;  %v2801_v28 = vsel %vm236_vm3, %v3824_v19, -inf }
 0x2ac   :  { %1609 = vmax.xlane.f32.xlu0 %v1608_v21 }
 0x2ae   :  { %1265 = vmax.xlane.f32.xlu1 %v1264_v22 }
 0x2b0   :  { %1776 = vmax.xlane.f32.xlu0 %v1775_v23 }
 0x2b2   :  { %1437 = vmax.xlane.f32.xlu1 %v1436_v24 }
 0x2b4   :  { %1947 = vmax.xlane.f32.xlu0 %v1946_v25 }
 0x2b8   :  { %2118 = vmax.xlane.f32.xlu0 %v2117_v26 }
 0x2bc   :  { %2460 = vmax.xlane.f32.xlu0 %v2459_v27 }
 0x2c0   :  { %2802 = vmax.xlane.f32.xlu0 %v2801_v28 }
 0x2c3   :  { %2294 = vrot.lane.b32.xlu1 %v3654_v9, %s3548_s20 }
 0x2d6   :  { %2465 = vrot.lane.b32.xlu0 %v3654_v9, %s3550_s23 }
 0x2e7   :  { %2289 = vmax.xlane.f32.xlu1 %v2288_v33 }
 0x2eb   :  { %2631 = vmax.xlane.f32.xlu1 %v2630_v36 }
 0x2ee   :  { %v239_v38 = vpop.xlane.xlu0 %238 }
 0x2ef   :  { %v240_v39 = vsub.f32 %v3774_v44, %v239_v38 }
 0x2f1   :  { %v241_v40 = vmul.f32 1.442695, %v240_v39 }
 0x2f2   :  { %v406_v41 = vpop.xlane.xlu1 %405 }
 0x2f3   :  { %3368 = vpow2.f32 %v241_v40  ;;  %v407_v42 = vsub.f32 %v3778_v47, %v406_v41 }
 0x2f5   :  { %v408_v43 = vmul.f32 1.442695, %v407_v42 }
 0x2f6   :  { %v3878_v52 = vpop.permute.xlu1 %1781 }
 0x2f7   :  { %3370 = vpow2.f32 %v408_v43 }
 0x2fa   :  { %v3881_v56 = vpop.permute.xlu1 %1952 }
 0x2fc   :  { %2636 = vrot.lane.b32.xlu1 %v3654_v9, %s3554_s27 }
 0x2fd   :  { %v3369_v45 = vpop.eup %3368 }
 0x2fe   :  { %3156 = vmatmul.mubr.msk.f32.vlgmr.msra.gmra.mrb[2].mxu0 %vm236_vm3, %v3369_v45  ;;  %v319_v46 = vsel %vm236_vm3, %v3369_v45, 0.0  ;;  %v3884_v58 = vpop.permute.xlu1 %2123 }
 0x2ff   :  { %3164 = vmatpush3.msra.mxu0 %v411_v30  ;;  %320 = vadd.xlane.f32.xlu0 %v319_v46 }
 0x300   :  { %2807 = vrot.lane.b32.xlu1 %v3654_v9, %s3555_s28  ;;  %3165 = vmatprep.mubr.msk.f32.mxu0 %vm3532_vm1, %v3531_v5 }
 0x301   :  { %v3371_v44 = vpop.eup %3370  ;;  %3173 = vmatprep.subr.mxu0 %v3531_v5 }
 0x302   :  { %3166 = vmatmul.mubr.msk.f32.vlgmr.msra.gmra.mrb[4].mxu0 %vm236_vm3, %v3371_v44  ;;  %v486_v54 = vsel %vm236_vm3, %v3371_v44, 0.0 }
 0x303   :  { %3174 = vmatpush3.msra.mxu0 %v583_v29  ;;  %3175 = vmatprep.mubr.msk.f32.mxu0 %vm3532_vm1, %v3531_v5 }
 0x304   :  { %v578_v47 = vpop.xlane.xlu0 %577  ;;  %3183 = vmatprep.subr.mxu0 %v3531_v5 }
 0x305   :  { %v579_v48 = vsub.f32 %v3782_v50, %v578_v47 }
 0x307   :  { %v580_v49 = vmul.f32 1.442695, %v579_v48 }
 0x308   :  { %v3888_v7 = vpop.permute.xlu0 %1614 }
 0x309   :  { %3372 = vpow2.f32 %v580_v49 }
 0x313   :  { %v3373_v51 = vpop.eup %3372 }
 0x314   :  { %3176 = vmatmul.mubr.msk.f32.vlgmr.msra.gmra.mrb[6].mxu0 %vm236_vm3, %v3373_v51  ;;  %v658_v50 = vsel %vm236_vm3, %v3373_v51, 0.0 }
 0x315   :  { %3184 = vmatpush3.msra.mxu0 %v755_v31  ;;  %3185 = vmatprep.mubr.msk.f32.mxu0 %vm3532_vm1, %v3531_v5 }
 0x316   :  { %3193 = vmatprep.subr.mxu0 %v3531_v5 }
 0x324   :  { %487 = vadd.xlane.f32.xlu1 %v486_v54 }
 0x328   :  { %659 = vadd.xlane.f32.xlu1 %v658_v50 }
 0x32f   :  { %v750_v60 = vpop.xlane.xlu1 %749 }
 0x330   :  { %v751_v62 = vsub.f32 %v3788_v53, %v750_v60 }
 0x332   :  { %v752_v0 = vmul.f32 1.442695, %v751_v62 }
 0x333   :  { %v922_v2 = vpop.xlane.xlu1 %921 }
 0x334   :  { %3374 = vpow2.f32 %v752_v0  ;;  %v923_v4 = vsub.f32 %v3792_v55, %v922_v2 }
 0x336   :  { %v924_v11 = vmul.f32 1.442695, %v923_v4 }
 0x337   :  { %v1094_v13 = vpop.xlane.xlu1 %1093 }
 0x338   :  { %3376 = vpow2.f32 %v924_v11  ;;  %v1095_v14 = vsub.f32 %v3796_v57, %v1094_v13 }
 0x339   :  { %v1610_v16 = vpop.xlane.xlu0 %1609 }
 0x33a   :  { %v1096_v17 = vmul.f32 1.442695, %v1095_v14  ;;  %v1611_v25 = vsub.f32 %v3804_v63, %v1610_v16 }
 0x33b   :  { %v1266_v18 = vpop.xlane.xlu1 %1265 }
 0x33c   :  { %3378 = vpow2.f32 %v1096_v17  ;;  %v1267_v20 = vsub.f32 %v3798_v59, %v1266_v18  ;;  %v1612_v29 = vmul.f32 1.442695, %v1611_v25 }
 0x33d   :  { %v1777_v21 = vpop.xlane.xlu0 %1776 }
 0x33e   :  { %v3375_v53 = vpop.eup %3374  ;;  %v1268_v22 = vmul.f32 1.442695, %v1267_v20  ;;  %v1778_v23 = vsub.f32 %v3806_v1, %v1777_v21 }
 0x33f   :  { %v1438_v24 = vpop.xlane.xlu1 %1437  ;;  %3186 = vmatmul.mubr.msk.f32.vlgmr.msra.gmra.mrb[8].mxu0 %vm236_vm3, %v3375_v53  ;;  %v830_v55 = vsel %vm236_vm3, %v3375_v53, 0.0 }
 0x340   :  { %3380 = vpow2.f32 %v1268_v22  ;;  %v1779_v57 = vmul.f32 1.442695, %v1778_v23  ;;  %v1439_v26 = vsub.f32 %v3800_v61, %v1438_v24  ;;  %3194 = vmatpush3.msra.mxu0 %v3846_v32  ;;  %831 = vadd.xlane.f32.xlu0 %v830_v55 }
 0x341   :  { %v1948_v59 = vpop.xlane.xlu0 %1947  ;;  %3195 = vmatprep.mubr.msk.f32.mxu0 %vm3532_vm1, %v3531_v5  ;;  %3203 = vmatprep.subr.mxu0 %v3531_v5 }
 0x342   :  { %v3377_v1 = vpop.eup %3376  ;;  %3382 = vpow2.f32 %v1779_v57  ;;  %v1440_v27 = vmul.f32 1.442695, %v1439_v26  ;;  %v1949_v28 = vsub.f32 %v3808_v3, %v1948_v59 }
 0x343   :  { %3196 = vmatmul.mubr.msk.f32.vlgmr.msra.gmra.mrb[10].mxu0 %vm236_vm3, %v3377_v1  ;;  %v1002_v63 = vsel %vm236_vm3, %v3377_v1, 0.0  ;;  %v2295_v46 = vpop.permute.xlu1 %2294 }
 0x344   :  { %3384 = vpow2.f32 %v1440_v27  ;;  %v1950_v61 = vmul.f32 1.442695, %v1949_v28  ;;  %3204 = vmatpush3.msra.mxu0 %v3852_v35  ;;  %1003 = vadd.xlane.f32.xlu0 %v1002_v63 }
 0x345   :  { %v2119_v30 = vpop.xlane.xlu0 %2118  ;;  %3205 = vmatprep.mubr.msk.f32.mxu0 %vm3532_vm1, %v3531_v5  ;;  %3213 = vmatprep.subr.mxu0 %v3531_v5 }
 0x346   :  { %v3379_v31 = vpop.eup %3378  ;;  %3386 = vpow2.f32 %v1950_v61  ;;  %v2120_v3 = vsub.f32 %v3810_v6, %v2119_v30 }
 0x347   :  { %3206 = vmatmul.mubr.msk.f32.vlgmr.msra.gmra.mrb[12].mxu0 %vm236_vm3, %v3379_v31  ;;  %v1174_v32 = vsel %vm236_vm3, %v3379_v31, 0.0  ;;  %3388 = vpow2.f32 %v1612_v29 }
 0x348   :  { %v2121_v33 = vmul.f32 1.442695, %v2120_v3  ;;  %3214 = vmatpush3.msra.mxu0 %v3850_v34  ;;  %1175 = vadd.xlane.f32.xlu1 %v1174_v32 }
 0x349   :  { %3215 = vmatprep.mubr.msk.f32.mxu0 %vm3532_vm1, %v3531_v5  ;;  %3223 = vmatprep.subr.mxu0 %v3531_v5  ;;  %v2461_v44 = vpop.xlane.xlu0 %2460 }
 0x34a   :  { %v3381_v35 = vpop.eup %3380  ;;  %3390 = vpow2.f32 %v2121_v33  ;;  %v2462_v47 = vsub.f32 %v3814_v12, %v2461_v44 }
 0x34b   :  { %3216 = vmatmul.mubr.msk.f32.vlgmr.msra.gmra.mrb[14].mxu0 %vm236_vm3, %v3381_v35  ;;  %v1346_v6 = vsel %vm236_vm3, %v3381_v35, 0.0 }
 0x34c   :  { %v3383_v36 = vpop.eup %3382  ;;  %3224 = vmatpush3.msra.mxu0 %v3856_v37  ;;  %1347 = vadd.xlane.f32.xlu0 %v1346_v6  ;;  %v2463_v51 = vmul.f32 1.442695, %v2462_v47 }
 0x34d   :  { %3225 = vmatprep.mubr.msk.f32.mxu0 %vm3532_vm1, %v3531_v5  ;;  %3233 = vmatprep.subr.mxu0 %v3531_v5  ;;  %v1857_v34 = vsel %vm236_vm3, %v3383_v36, 0.0  ;;  %v2803_v54 = vpop.xlane.xlu0 %2802 }
 0x34e   :  { %v3385_v38 = vpop.eup %3384  ;;  %1858 = vadd.xlane.f32.xlu1 %v1857_v34 }
 0x34f   :  { %3226 = vmatmul.mubr.msk.f32.vlgmr.msra.gmra.mrb[16].mxu0 %vm236_vm3, %v3385_v38  ;;  %v1518_v39 = vsel %vm236_vm3, %v3385_v38, 0.0 }
 0x350   :  { %v3387_v40 = vpop.eup %3386  ;;  %3234 = vmatpush3.msra.mxu0 %v3888_v7  ;;  %1519 = vadd.xlane.f32.xlu0 %v1518_v39 }
 0x351   :  { %3235 = vmatprep.mubr.msk.f32.mxu0 %vm3532_vm1, %v3531_v5  ;;  %3243 = vmatprep.subr.mxu0 %v3531_v5  ;;  %v3389_v37 = vpop.eup %3388  ;;  %v2028_v41 = vsel %vm236_vm3, %v3387_v40, 0.0  ;;  %v2466_v2 = vpop.permute.xlu0 %2465 }
 0x352   :  { %v1690_v45 = vsel %vm236_vm3, %v3389_v37, 0.0 }
 0x353   :  { %3236 = vmatmul.mubr.msk.f32.vlgmr.msra.gmra.mrb[18].mxu0 %vm236_vm3, %v3389_v37 }
 0x354   :  { %v3391_v42 = vpop.eup %3390  ;;  %3244 = vmatpush3.msra.mxu0 %v3878_v52  ;;  %2029 = vadd.xlane.f32.xlu0 %v2028_v41 }
 0x355   :  { %3245 = vmatprep.mubr.msk.f32.mxu0 %vm3532_vm1, %v3531_v5  ;;  %3253 = vmatprep.subr.mxu0 %v3531_v5  ;;  %v2199_v43 = vsel %vm236_vm3, %v3391_v42, 0.0 }
 0x356   :  { %2200 = vadd.xlane.f32.xlu1 %v2199_v43 }
 0x357   :  { %3246 = vmatmul.mubr.msk.f32.vlgmr.msra.gmra.mrb[20].mxu0 %vm236_vm3, %v3383_v36 }
 0x358   :  { %3254 = vmatpush3.msra.mxu0 %v3881_v56  ;;  %1691 = vadd.xlane.f32.xlu0 %v1690_v45 }
 0x359   :  { %3255 = vmatprep.mubr.msk.f32.mxu0 %vm3532_vm1, %v3531_v5  ;;  %3263 = vmatprep.subr.mxu0 %v3531_v5 }
 0x35b   :  { %3256 = vmatmul.mubr.msk.f32.vlgmr.msra.gmra.mrb[22].mxu0 %vm236_vm3, %v3387_v40 }
 0x35c   :  { %3264 = vmatpush3.msra.mxu0 %v3884_v58  ;;  %3265 = vmatprep.mubr.msk.f32.mxu0 %vm3532_vm1, %v3531_v5  ;;  %v2804_v58 = vsub.f32 %v3824_v19, %v2803_v54 }
 0x35d   :  { %3273 = vmatprep.subr.mxu0 %v3531_v5 }
 0x35e   :  { %v2805_v62 = vmul.f32 1.442695, %v2804_v58 }
 0x35f   :  { %3266 = vmatmul.mubr.msk.f32.vlgmr.msra.gmra.mrb[24].mxu0 %vm236_vm3, %v3391_v42 }
 0x360   :  { %3274 = vmatpush3.msra.mxu0 %v2295_v46  ;;  %3275 = vmatprep.mubr.msk.f32.mxu0 %vm3532_vm1, %v3531_v5 }
 0x361   :  { %3283 = vmatprep.subr.mxu0 %v3531_v5 }
 0x374   :  { %v2290_v48 = vpop.xlane.xlu1 %2289 }
 0x375   :  { %v2291_v49 = vsub.f32 %v3812_v8, %v2290_v48 }
 0x377   :  { %v2292_v52 = vmul.f32 1.442695, %v2291_v49 }
 0x378   :  { %v2632_v56 = vpop.xlane.xlu1 %2631 }
 0x379   :  { %3392 = vpow2.f32 %v2292_v52  ;;  %v2633_v50 = vsub.f32 %v3818_v15, %v2632_v56 }
 0x37a   :  { %3394 = vpow2.f32 %v2463_v51 }
 0x37b   :  { %v2634_v60 = vmul.f32 1.442695, %v2633_v50 }
 0x37c   :  { %v2637_v4 = vpop.permute.xlu1 %2636 }
 0x37d   :  { %3396 = vpow2.f32 %v2634_v60 }
 0x37e   :  { %3398 = vpow2.f32 %v2805_v62 }
 0x380   :  { %v2808_v7 = vpop.permute.xlu1 %2807 }
 0x383   :  { %v3393_v0 = vpop.eup %3392 }
 0x384   :  { %3276 = vmatmul.mubr.msk.f32.vlgmr.msra.gmra.mrb[26].mxu0 %vm236_vm3, %v3393_v0  ;;  %v2370_v8 = vsel %vm236_vm3, %v3393_v0, 0.0  ;;  %v3395_v12 = vpop.eup %3394 }
 0x385   :  { %3284 = vmatpush3.msra.mxu0 %v2466_v2  ;;  %2371 = vadd.xlane.f32.xlu1 %v2370_v8  ;;  %v2541_v15 = vsel %vm236_vm3, %v3395_v12, 0.0 }
 0x386   :  { %3285 = vmatprep.mubr.msk.f32.mxu0 %vm3532_vm1, %v3531_v5  ;;  %3293 = vmatprep.subr.mxu0 %v3531_v5 }
 0x387   :  { %v3397_v19 = vpop.eup %3396 }
 0x388   :  { %3286 = vmatmul.mubr.msk.f32.vlgmr.msra.gmra.mrb[28].mxu0 %vm236_vm3, %v3395_v12  ;;  %v2712_v11 = vsel %vm236_vm3, %v3397_v19, 0.0  ;;  %v3399_v13 = vpop.eup %3398 }
 0x389   :  { %3294 = vmatpush3.msra.mxu0 %v2637_v4  ;;  %2542 = vadd.xlane.f32.xlu1 %v2541_v15  ;;  %v2883_v14 = vsel %vm236_vm3, %v3399_v13, 0.0 }
 0x38a   :  { %3295 = vmatprep.mubr.msk.f32.mxu0 %vm3532_vm1, %v3531_v5  ;;  %3303 = vmatprep.subr.mxu0 %v3531_v5 }
 0x38c   :  { %3296 = vmatmul.mubr.msk.f32.vlgmr.msra.gmra.mrb[30].mxu0 %vm236_vm3, %v3397_v19  ;;  %v321_v16 = vpop.xlane.xlu0 %320 }
 0x38d   :  { %3304 = vmatpush3.msra.mxu0 %v2808_v7  ;;  %2713 = vadd.xlane.f32.xlu1 %v2712_v11  ;;  %3400 = vrcp.f32 %v321_v16 }
 0x38e   :  { %3305 = vmatprep.mubr.msk.f32.mxu0 %vm3532_vm1, %v3531_v5 }
 0x390   :  { %3306 = vmatmul.mubr.msk.f32.vlgmr.msra.gmra.mrb[32].mxu0 %vm236_vm3, %v3399_v13 }
 0x391   :  { %2884 = vadd.xlane.f32.xlu1 %v2883_v14 }
 0x397   :  { %v3401_v18 = vpop.eup %3400 }
 0x3b1   :  { %v488_v17 = vpop.xlane.xlu1 %487 }
 0x3b2   :  { %3402 = vrcp.f32 %v488_v17 }
 0x3b5   :  { %v660_v25 = vpop.xlane.xlu1 %659 }
 0x3b6   :  { %3404 = vrcp.f32 %v660_v25  ;;  %v2897_v25 = vld [vmem:[#allocation8 + $0x8] sm:$0xff] }
 0x3bc   :  { %v3403_v23 = vpop.eup %3402 }
 0x3c0   :  { %v3405_v57 = vpop.eup %3404 }
 0x3cd   :  { %v832_v27 = vpop.xlane.xlu0 %831 }
 0x3ce   :  { %3406 = vrcp.f32 %v832_v27  ;;  %v2899_v27 = vld [vmem:[#allocation8 + $0x18] sm:$0xff] }
 0x3d1   :  { %v315_v20 = vpop.f32.mrb[2].mxu0  ;;  %v1004_v28 = vpop.xlane.xlu0 %1003 }
 0x3d2   :  { %v323_v21 = vmul.f32 %v3401_v18, %v315_v20  ;;  %v3157_v53 = vpop.f32.mrb[3].mxu0  ;;  %3408 = vrcp.f32 %v1004_v28 }
 0x3d4   :  { %v324_v22 = vadd.f32 %v323_v21, %v3656_v10 }
 0x3d5   :  { %v482_v24 = vpop.f32.mrb[4].mxu0  ;;  %v1176_v29 = vpop.xlane.xlu1 %1175 }
 0x3d6   :  { %325 = vst.msk [vmem:[#allocation2] sm:$0xff] %vm160_vm2, %v324_v22  ;;  %v490_v5 = vmul.f32 %v3403_v23, %v482_v24  ;;  %v3167_v55 = vpop.f32.mrb[5].mxu0  ;;  %3410 = vrcp.f32 %v1176_v29 }
 0x3d7   :  { %v2896_v55 = vld [vmem:[#allocation8] sm:$0xff] }
 0x3d8   :  { %492 = vrot.lane.b32.xlu1 %v490_v5, %s3556_s0  ;;  %v3407_v30 = vpop.eup %3406 }
 0x3d9   :  { %v1348_v63 = vpop.xlane.xlu0 %1347 }
 0x3da   :  { %3412 = vrcp.f32 %v1348_v63 }
 0x3db   :  { %v1859_v42 = vpop.xlane.xlu1 %1858 }
 0x3dc   :  { %v3409_v35 = vpop.eup %3408 }
 0x3dd   :  { %v1520_v61 = vpop.xlane.xlu0 %1519 }
 0x3de   :  { %3414 = vrcp.f32 %v1520_v61 }
 0x3e0   :  { %v3411_v39 = vpop.eup %3410 }
 0x3e1   :  { %v2030_v3 = vpop.xlane.xlu0 %2029 }
 0x3e3   :  { %v2201_v52 = vpop.xlane.xlu1 %2200 }
 0x3e4   :  { %v3413_v43 = vpop.eup %3412 }
 0x3e5   :  { %v1692_v38 = vpop.xlane.xlu0 %1691 }
 0x3e6   :  { %3416 = vrcp.f32 %v1692_v38 }
 0x3e7   :  { %v654_v26 = vpop.f32.mrb[6].mxu0  ;;  %3418 = vrcp.f32 %v1859_v42 }
 0x3e8   :  { %v662_v59 = vmul.f32 %v3405_v57, %v654_v26  ;;  %v3177_v1 = vpop.f32.mrb[7].mxu0  ;;  %v3415_v47 = vpop.eup %3414  ;;  %3420 = vrcp.f32 %v2030_v3  ;;  %v3323_v57 = vpack.c.bf16 %v2897_v25, %v2896_v55 }
 0x3e9   :  { %3422 = vrcp.f32 %v2201_v52  ;;  %v2898_v1 = vld [vmem:[#allocation8 + $0x10] sm:$0xff] }
 0x3ea   :  { %664 = vrot.lane.b32.xlu0 %v662_v59, %s3529_s6  ;;  %3324 = vmatprep.subr.bf16.mxu1 %v3323_v57  ;;  %v3327_v61 = vpack.c.bf16 %v2899_v27, %v2898_v1 }
 0x3eb   :  { %3326 = vmatpush3.bf16.msra.mxu1 %v3323_v57 }
 0x3ec   :  { %3328 = vmatprep.subr.bf16.mxu1 %v3327_v61 }
 0x3ef   :  { %3330 = vmatpush3.bf16.msra.mxu1 %v3327_v61 }
 0x3f0   :  { %v3417_v54 = vpop.eup %3416 }
 0x3f1   :  { %v3419_v62 = vpop.eup %3418 }
 0x3f2   :  { %v3421_v12 = vpop.eup %3420 }
 0x3f3   :  { %v3423_v7 = vpop.eup %3422 }
 0x412   :  { %v826_v31 = vpop.f32.mrb[8].mxu0  ;;  %v2372_v16 = vpop.xlane.xlu1 %2371 }
 0x413   :  { %v834_v32 = vmul.f32 %v3407_v30, %v826_v31  ;;  %v3187_v33 = vpop.f32.mrb[9].mxu0  ;;  %3424 = vrcp.f32 %v2372_v16 }
 0x415   :  { %836 = vrot.lane.b32.xlu1 %v834_v32, %s3557_s21 }
 0x416   :  { %v998_v6 = vpop.f32.mrb[10].mxu0  ;;  %v2543_v17 = vpop.xlane.xlu1 %2542 }
 0x417   :  { %v1006_v36 = vmul.f32 %v3409_v35, %v998_v6  ;;  %v3197_v34 = vpop.f32.mrb[11].mxu0  ;;  %3426 = vrcp.f32 %v2543_v17 }
 0x419   :  { %1008 = vrot.lane.b32.xlu1 %v1006_v36, %s3558_s3 }
 0x41a   :  { %v1170_v40 = vpop.f32.mrb[12].mxu0  ;;  %v2714_v18 = vpop.xlane.xlu1 %2713 }
 0x41b   :  { %v1178_v37 = vmul.f32 %v3411_v39, %v1170_v40  ;;  %v3207_v41 = vpop.f32.mrb[13].mxu0  ;;  %3428 = vrcp.f32 %v2714_v18 }
 0x41d   :  { %1180 = vrot.lane.b32.xlu0 %v1178_v37, %s3559_s29  ;;  %v3425_v22 = vpop.eup %3424 }
 0x41e   :  { %v1342_v45 = vpop.f32.mrb[14].mxu0  ;;  %v2885_v20 = vpop.xlane.xlu1 %2884 }
 0x41f   :  { %v1350_v46 = vmul.f32 %v3413_v43, %v1342_v45  ;;  %v3217_v44 = vpop.f32.mrb[15].mxu0  ;;  %3430 = vrcp.f32 %v2885_v20 }
 0x421   :  { %1352 = vrot.lane.b32.xlu1 %v1350_v46, %s3560_s7  ;;  %v3427_v26 = vpop.eup %3426 }
 0x422   :  { %v1514_v48 = vpop.f32.mrb[16].mxu0 }
 0x423   :  { %v1522_v49 = vmul.f32 %v3415_v47, %v1514_v48  ;;  %v3227_v51 = vpop.f32.mrb[17].mxu0 }
 0x425   :  { %1524 = vrot.lane.b32.xlu0 %v1522_v49, %s3561_s8  ;;  %v3429_v31 = vpop.eup %3428 }
 0x426   :  { %v1686_v56 = vpop.f32.mrb[18].mxu0 }
 0x427   :  { %v1694_v50 = vmul.f32 %v3417_v54, %v1686_v56  ;;  %v3237_v58 = vpop.f32.mrb[19].mxu0 }
 0x429   :  { %v1695_v60 = vadd.f32 %v1694_v50, %v3654_v9  ;;  %v3431_v35 = vpop.eup %3430 }
 0x42a   :  { %v1853_v0 = vpop.f32.mrb[20].mxu0 }
 0x42b   :  { %1696 = vst.msk [vmem:[#allocation2 + $0x8] sm:$0xff] %vm160_vm2, %v1695_v60  ;;  %v1861_v2 = vmul.f32 %v3419_v62, %v1853_v0  ;;  %v3247_v8 = vpop.f32.mrb[21].mxu0 }
 0x42d   :  { %1863 = vrot.lane.b32.xlu1 %v1861_v2, %s3556_s0 }
 0x42e   :  { %v2024_v4 = vpop.f32.mrb[22].mxu0 }
 0x42f   :  { %v2032_v15 = vmul.f32 %v3421_v12, %v2024_v4  ;;  %v3257_v19 = vpop.f32.mrb[23].mxu0  ;;  %v3064_v4 = vld [vmem:[%s4042_s4] ss:$0 sm:$0xff] }
 0x431   :  { %2034 = vrot.lane.b32.xlu0 %v2032_v15, %s3529_s6 }
 0x432   :  { %v2195_v11 = vpop.f32.mrb[24].mxu0 }
 0x433   :  { %v2203_v13 = vmul.f32 %v3423_v7, %v2195_v11  ;;  %v3267_v14 = vpop.f32.mrb[25].mxu0 }
 0x435   :  { %2205 = vrot.lane.b32.xlu1 %v2203_v13, %s3557_s21 }
 0x44a   :  { %v493_v21 = vpop.permute.xlu1 %492 }
 0x44b   :  { %v495_v53 = vadd.f32 %v493_v21, %v3656_v10 }
 0x44d   :  { %497 = vst.msk [vmem:[#allocation2] sm:$0xff] %vm496_vm4, %v495_v53 }
 0x457   :  { %v2366_v23 = vpop.f32.mrb[26].mxu0 }
 0x458   :  { %v2374_v24 = vmul.f32 %v3425_v22, %v2366_v23  ;;  %v3277_v5 = vpop.f32.mrb[27].mxu0 }
 0x45a   :  { %2376 = vrot.lane.b32.xlu1 %v2374_v24, %s3558_s3 }
 0x45b   :  { %v2537_v59 = vpop.f32.mrb[28].mxu0 }
 0x45c   :  { %v2545_v28 = vmul.f32 %v3427_v26, %v2537_v59  ;;  %v3287_v63 = vpop.f32.mrb[29].mxu0  ;;  %v665_v29 = vpop.permute.xlu0 %664 }
 0x45d   :  { %v667_v30 = vadd.f32 %v665_v29, %v3656_v10 }
 0x45e   :  { %2547 = vrot.lane.b32.xlu0 %v2545_v28, %s3559_s29 }
 0x45f   :  { %669 = vst.msk [vmem:[#allocation2] sm:$0xff] %vm668_vm5, %v667_v30  ;;  %v2708_v3 = vpop.f32.mrb[30].mxu0 }
 0x460   :  { %v2716_v32 = vmul.f32 %v3429_v31, %v2708_v3  ;;  %v3297_v33 = vpop.f32.mrb[31].mxu0 }
 0x462   :  { %2718 = vrot.lane.b32.xlu1 %v2716_v32, %s3560_s7 }
 0x463   :  { %v2879_v6 = vpop.f32.mrb[32].mxu0 }
 0x464   :  { %v2887_v36 = vmul.f32 %v3431_v35, %v2879_v6  ;;  %v3307_v34 = vpop.f32.mrb[33].mxu0 }
 0x466   :  { %2889 = vrot.lane.b32.xlu0 %v2887_v36, %s3561_s8 }
 0x487   :  { %v837_v38 = vpop.permute.xlu1 %836 }
 0x488   :  { %v839_v39 = vadd.f32 %v837_v38, %v3656_v10 }
 0x48a   :  { %841 = vst.msk [vmem:[#allocation2] sm:$0xff] %vm840_vm6, %v839_v39 }
 0x48b   :  { %v1009_v40 = vpop.permute.xlu1 %1008 }
 0x48c   :  { %v1011_v37 = vadd.f32 %v1009_v40, %v3656_v10 }
 0x48e   :  { %1013 = vst.msk [vmem:[#allocation2] sm:$0xff] %vm1012_vm7, %v1011_v37 }
 0x48f   :  { %v1181_v41 = vpop.permute.xlu0 %1180 }
 0x490   :  { %v1183_v42 = vadd.f32 %v1181_v41, %v3656_v10 }
 0x492   :  { %1185 = vst.msk [vmem:[#allocation2] sm:$0xff] %vm1184_vm8, %v1183_v42 }
 0x493   :  { %v1353_v43 = vpop.permute.xlu1 %1352 }
 0x494   :  { %v1355_v45 = vadd.f32 %v1353_v43, %v3656_v10 }
 0x496   :  { %1357 = vst.msk [vmem:[#allocation2] sm:$0xff] %vm1356_vm9, %v1355_v45 }
 0x497   :  { %v1525_v46 = vpop.permute.xlu0 %1524 }
 0x498   :  { %v1527_v44 = vadd.f32 %v1525_v46, %v3656_v10 }
 0x49a   :  { %1529 = vst.msk [vmem:[#allocation2] sm:$0xff] %vm1528_vm10, %v1527_v44 }
 0x49f   :  { %v1864_v47 = vpop.permute.xlu1 %1863 }
 0x4a0   :  { %v1866_v48 = vadd.f32 %v1864_v47, %v3654_v9 }
 0x4a1   :  { %v2894_v49 = vld [vmem:[#allocation2] sm:$0xff] }
 0x4a2   :  { %1867 = vst.msk [vmem:[#allocation2 + $0x8] sm:$0xff] %vm496_vm4, %v1866_v48  ;;  %3316 = vmatprep.mubr.msk.f32.mxu1 %vm2907_vm11, %v2894_v49 }
 0x4a3   :  { %v2035_v51 = vpop.permute.xlu0 %2034 }
 0x4a4   :  { %v2037_v52 = vadd.f32 %v2035_v51, %v3654_v9 }
 0x4a6   :  { %2038 = vst.msk [vmem:[#allocation2 + $0x8] sm:$0xff] %vm668_vm5, %v2037_v52 }
 0x4a7   :  { %v2206_v54 = vpop.permute.xlu1 %2205 }
 0x4a8   :  { %v2208_v56 = vadd.f32 %v2206_v54, %v3654_v9 }
 0x4aa   :  { %2209 = vst.msk [vmem:[#allocation2 + $0x8] sm:$0xff] %vm840_vm6, %v2208_v56 }
 0x4cc   :  { %v2377_v10 = vpop.permute.xlu1 %2376 }
 0x4cd   :  { %v2379_v50 = vadd.f32 %v2377_v10, %v3654_v9 }
 0x4cf   :  { %2380 = vst.msk [vmem:[#allocation2 + $0x8] sm:$0xff] %vm1012_vm7, %v2379_v50 }
 0x4d0   :  { %v2548_v58 = vpop.permute.xlu0 %2547 }
 0x4d1   :  { %v2550_v60 = vadd.f32 %v2548_v58, %v3654_v9 }
 0x4d3   :  { %2551 = vst.msk [vmem:[#allocation2 + $0x8] sm:$0xff] %vm1184_vm8, %v2550_v60 }
 0x4d4   :  { %v2719_v62 = vpop.permute.xlu1 %2718 }
 0x4d5   :  { %v2721_v0 = vadd.f32 %v2719_v62, %v3654_v9 }
 0x4d7   :  { %2722 = vst.msk [vmem:[#allocation2 + $0x8] sm:$0xff] %vm1356_vm9, %v2721_v0 }
 0x4d8   :  { %v2890_v2 = vpop.permute.xlu0 %2889 }
 0x4d9   :  { %v2892_v8 = vadd.f32 %v2890_v2, %v3654_v9 }
 0x4db   :  { %2893 = vst.msk [vmem:[#allocation2 + $0x8] sm:$0xff] %vm1528_vm10, %v2892_v8 }
 0x4e2   :  { %v2895_v12 = vld [vmem:[#allocation2 + $0x8] sm:$0xff] }
 0x4e3   :  { %3317 = vmatmul.mubr.msk.f32.vlgmr.msra.gmra.mrb[32].mxu1 %vm2907_vm11, %v2895_v12 }
 0x5b6   :  { %v3318_v15 = vpop.f32.mrb[32].mxu1 }
 0x5b7   :  { %v2986_v19 = vadd.f32 %v3318_v15, %v3064_v4  ;;  %v2980_v7 = vpop.f32.mrb[33].mxu1 }
 0x5b8   :  { %v2981_v11 = vadd.f32 %v3064_v4, %v2980_v7 }
 0x5b9   :  { %v2990_v13 = vmax.f32 %v2986_v19, 0.0 }
 0x5ba   :  { %v2989_v14 = vmax.f32 %v2981_v11, 0.0 }
 0x5bb   :  { %v2992_v16 = vadd.f32 %v2990_v13, %v2895_v12 }
 0x5bc   :  { %v2991_v17 = vadd.f32 %v2989_v14, %v2894_v49 }
 0x5bd   :  { %2994 = vst.msk [vmem:[#allocation9 + $0x8] sm:$0xff] %vm2907_vm11, %v2992_v16 }
 0x5be   :  { %2993 = vst.msk [vmem:[#allocation9] sm:$0xff] %vm2907_vm11, %v2991_v17 }
 0x5bf   :  { %3509 = shalt.err (!%p3506_p0)
}
 0x5c0   :  { %s3510_s14 = scalar_lea.hbm %s4043_s5, 256 }
 0x5c1   :  { %p3511_p1 = scmp.ne.s32.totalorder %s4043_s5, %s3510_s14  ;;  %p3514_p2 = scmp.lt.u32.totalorder %s3510_s14, %s4043_s5 }
 0x5c3   :  { %p3516_p3 = pnand %p3514_p2, %p3511_p1 }
 0x5c5   :  { %3519 = shalt.err (!%p3516_p3)
}
 0x5c6   :  { %3006 = dma.vmem_to_hbm [thread:$0]  %s3001_s11, 256, %s4043_s5, [#allocation5], %s3528_s30, %s3528_s30, %s3529_s6  }
 0x5c7   :  { %3524 = dma.done.wait [#allocation5], 256  }
 0x5c8   :  { %3525 = vsyncadd [#allocation5], 4294967040 }
 0x5c9   :  { %3010 = vsyncpa [#allocation4], 1 }
 0x5ca   :  { %3011 = vsyncpa [#allocation7], 1 }
 0x5cb   :  { %3012 = vsyncpa [#allocation5], 1 }

</bundles_post_ra>
